<compile_context>
chip_gen: v7x
topology: tpu7x:2x2x1
jax: 0.10.0
libtpu: 0.0.40
codegen_flags: <defaults>
</compile_context>

<pallas_src>
import functools

import jax
import jax.numpy as jnp
from jax import lax
from jax.experimental import pallas as pl
from jax.experimental.pallas import tpu as pltpu


def _lstm_backbone_kernel(x_ref,        # (T*B, F)  time-major, batch padded
                          w_ih0_ref,    # (F, 4H)
                          w_hh0_ref,    # (H, 4H)
                          b0_ref,       # (1, 4H)   b_ih + b_hh, layer 0
                          w_ih1_ref,    # (H, 4H)
                          w_hh1_ref,    # (H, 4H)
                          b1_ref,       # (1, 4H)   b_ih + b_hh, layer 1
                          w_out_ref,    # (H, Np)   lane-padded final Linear
                          b_out_ref,    # (1, Np)
                          out_ref,      # (B, Np)
                          *, T):
    TB, _ = x_ref.shape
    H = w_hh0_ref.shape[0]
    B = TB // T
    f32 = jnp.float32

    # Recurrent weights loaded once, live in vregs across the unrolled loop.
    w_hh0 = w_hh0_ref[...]
    w_hh1 = w_hh1_ref[...]

    # Lane mask for single-pass activations, PyTorch gate order (i, f, g, o):
    # sigmoid on lanes [0, 2H) and [3H, 4H)  (i, f, o);  tanh on [2H, 3H) (g).
    lane = lax.broadcasted_iota(jnp.int32, (B, 4 * H), 1)
    sig_mask = jnp.logical_or(lane < 2 * H, lane >= 3 * H)

    def gate_update(z, c):
        a = jnp.where(sig_mask, jax.nn.sigmoid(z), jnp.tanh(z))
        i = a[:, 0 * H:1 * H]
        f = a[:, 1 * H:2 * H]
        g = a[:, 2 * H:3 * H]
        o = a[:, 3 * H:4 * H]
        c_new = f * c + i * g
        h_new = o * jnp.tanh(c_new)
        return h_new, c_new

    # ---- Layer 0: batched input projection (off the recurrence path). ----
    x0p = (jnp.dot(x_ref[...], w_ih0_ref[...], preferred_element_type=f32)
           + b0_ref[...])                                    # (T*B, 4H)

    h = jnp.zeros((B, H), f32)
    c = jnp.zeros((B, H), f32)
    h0_seq = []
    # Fully unrolled: T is a small static trip count (live ranges are tiny).
    for t in range(T):
        z = x0p[t * B:(t + 1) * B, :] + jnp.dot(
            h, w_hh0, preferred_element_type=f32)
        h, c = gate_update(z, c)
        h0_seq.append(h)

    # ---- Layer 1: batched projection of the layer-0 output sequence. ----
    h0_all = jnp.concatenate(h0_seq, axis=0)                 # (T*B, H)
    x1p = (jnp.dot(h0_all, w_ih1_ref[...], preferred_element_type=f32)
           + b1_ref[...])                                    # (T*B, 4H)

    h = jnp.zeros((B, H), f32)
    c = jnp.zeros((B, H), f32)
    for t in range(T):
        z = x1p[t * B:(t + 1) * B, :] + jnp.dot(
            h, w_hh1, preferred_element_type=f32)
        h, c = gate_update(z, c)

    # ---- Final Linear on the last timestep's top-layer hidden state. ----
    pred = (jnp.dot(h, w_out_ref[...], preferred_element_type=f32)
            + b_out_ref[...])
    out_ref[...] = pred.astype(out_ref.dtype)


@jax.jit
def lstm_backbone_forward(x, params):
    """x: (B, T, F) batch_first float32 -> (B, n_targets) float32."""
    B, T, F = x.shape
    H = params["w_hh0"].shape[0]
    n_targets = params["w_out"].shape[1]

    # Sublane-align the batch (8 f32 sublanes) and lane-align the output (128).
    Bp = max(8, ((B + 7) // 8) * 8)
    Np = max(128, ((n_targets + 127) // 128) * 128)

    x_tbf = jnp.transpose(x, (1, 0, 2)).astype(jnp.float32)          # (T, B, F)
    x_tbf = jnp.pad(x_tbf, ((0, 0), (0, Bp - B), (0, 0)))            # (T, Bp, F)
    x2d = x_tbf.reshape(T * Bp, F)                                   # (T*Bp, F)

    w_out_p = jnp.pad(params["w_out"], ((0, 0), (0, Np - n_targets)))
    b_out_p = jnp.pad(params["b_out"], ((0, 0), (0, Np - n_targets)))

    vmem_spec = pl.BlockSpec(memory_space=pltpu.MemorySpace.VMEM)
    out = pl.pallas_call(
        functools.partial(_lstm_backbone_kernel, T=T),
        out_shape=jax.ShapeDtypeStruct((Bp, Np), jnp.float32),
        in_specs=[vmem_spec] * 9,
        out_specs=vmem_spec,
    )(x2d,
      params["w_ih0"], params["w_hh0"], params["b0"],
      params["w_ih1"], params["w_hh1"], params["b1"],
      w_out_p, b_out_p)

    return out[:B, :n_targets]


def init_params(key, n_features, n_targets, hidden_units):
    """Deterministic init matching PyTorch shapes (weights pre-transposed)."""
    H = hidden_units
    k = 1.0 / jnp.sqrt(jnp.float32(H))
    keys = jax.random.split(key, 10)

    def u(kk, shape):
        return jax.random.uniform(kk, shape, jnp.float32, -k, k)

    # PyTorch stores weight_ih_l0: (4H, F); we keep the transpose (F, 4H).
    params = {
        "w_ih0": u(keys[0], (n_features, 4 * H)),
        "w_hh0": u(keys[1], (H, 4 * H)),
        "b0":    (u(keys[2], (1, 4 * H)) + u(keys[3], (1, 4 * H))),  # b_ih + b_hh
        "w_ih1": u(keys[4], (H, 4 * H)),
        "w_hh1": u(keys[5], (H, 4 * H)),
        "b1":    (u(keys[6], (1, 4 * H)) + u(keys[7], (1, 4 * H))),
        "w_out": u(keys[8], (H, n_targets)),
        "b_out": u(keys[9], (1, n_targets)),
    }
    return params


def reference_forward(x, p):
    """Pure-JAX reference with PyTorch semantics (for correctness check)."""
    B, T, _ = x.shape
    H = p["w_hh0"].shape[0]

    def cell(x_t, h, c, w_ih, w_hh, b):
        z = x_t @ w_ih + h @ w_hh + b
        i = jax.nn.sigmoid(z[:, 0 * H:1 * H])
        f = jax.nn.sigmoid(z[:, 1 * H:2 * H])
        g = jnp.tanh(z[:, 2 * H:3 * H])
        o = jax.nn.sigmoid(z[:, 3 * H:4 * H])
        c = f * c + i * g
        h = o * jnp.tanh(c)
        return h, c

    h0 = c0 = h1 = c1 = jnp.zeros((B, H), jnp.float32)
    for t in range(T):
        h0, c0 = cell(x[:, t, :], h0, c0, p["w_ih0"], p["w_hh0"], p["b0"])
        h1, c1 = cell(h0, h1, c1, p["w_ih1"], p["w_hh1"], p["b1"])
    return h1 @ p["w_out"] + p["b_out"]


if __name__ == "__main__":
    # Small shapes consistent with the module's forward:
    B, T, F = 2, 8, 4          # batch, seq_len, n_features
    H, n_targets = 32, 3       # hidden_units, n_targets

    key = jax.random.PRNGKey(0)
    kx, kp = jax.random.split(key)
    x = jax.random.normal(kx, (B, T, F), jnp.float32)
    params = init_params(kp, F, n_targets, H)

    out = lstm_backbone_forward(x, params)
    out = jax.block_until_ready(out)

    ref = reference_forward(x, params)
    assert out.shape == (B, n_targets)
    assert jnp.allclose(out, ref, atol=1e-5, rtol=1e-5), (out, ref)

    print("KERNEL_OK")
</pallas_src>

<mosaic_0001>
module attributes {stable_mosaic.version = 11 : i64} {
  func.func @_lstm_backbone_kernel(%arg0: memref<64x4xf32, #tpu.memory_space<vmem>>, %arg1: memref<4x128xf32, #tpu.memory_space<vmem>>, %arg2: memref<32x128xf32, #tpu.memory_space<vmem>>, %arg3: memref<1x128xf32, #tpu.memory_space<vmem>>, %arg4: memref<32x128xf32, #tpu.memory_space<vmem>>, %arg5: memref<32x128xf32, #tpu.memory_space<vmem>>, %arg6: memref<1x128xf32, #tpu.memory_space<vmem>>, %arg7: memref<32x128xf32, #tpu.memory_space<vmem>>, %arg8: memref<1x128xf32, #tpu.memory_space<vmem>>, %arg9: memref<8x128xf32, #tpu.memory_space<vmem>>) attributes {dimension_semantics = [], scalar_prefetch = 0 : i64, scratch_operands = 0 : i64, tpu.core_type = #tpu.core_type<tc>} {
    %c0 = arith.constant 0 : index
    %c0_0 = arith.constant 0 : index
    %0 = vector.load %arg2[%c0, %c0_0] : memref<32x128xf32, #tpu.memory_space<vmem>>, vector<32x128xf32>
    %c0_1 = arith.constant 0 : index
    %c0_2 = arith.constant 0 : index
    %1 = vector.load %arg5[%c0_1, %c0_2] : memref<32x128xf32, #tpu.memory_space<vmem>>, vector<32x128xf32>
    %2 = tpu.iota {dimensions = array<i32: 1>} : vector<8x128xi32>
    %c64_i32 = arith.constant 64 : i32
    %3 = vector.broadcast %c64_i32 : i32 to vector<8x128xi32>
    %4 = arith.cmpi slt, %2, %3 : vector<8x128xi32>
    %c96_i32 = arith.constant 96 : i32
    %5 = vector.broadcast %c96_i32 : i32 to vector<8x128xi32>
    %6 = arith.cmpi sge, %2, %5 : vector<8x128xi32>
    %7 = arith.ori %4, %6 : vector<8x128xi1>
    %c0_3 = arith.constant 0 : index
    %c0_4 = arith.constant 0 : index
    %8 = vector.load %arg0[%c0_3, %c0_4] : memref<64x4xf32, #tpu.memory_space<vmem>>, vector<64x4xf32>
    %c0_5 = arith.constant 0 : index
    %c0_6 = arith.constant 0 : index
    %9 = vector.load %arg1[%c0_5, %c0_6] : memref<4x128xf32, #tpu.memory_space<vmem>>, vector<4x128xf32>
    %cst = arith.constant dense<0.000000e+00> : vector<64x128xf32>
    %10 = tpu.matmul %8, %9, %cst {dimension_numbers = #tpu.dot_dimension_numbers<[1], [0], [0], [1], [0, 0, 1, 1], [], []>} : vector<64x4xf32>, vector<4x128xf32>, vector<64x128xf32> -> vector<64x128xf32>
    %c0_7 = arith.constant 0 : index
    %c0_8 = arith.constant 0 : index
    %11 = vector.load %arg3[%c0_7, %c0_8] : memref<1x128xf32, #tpu.memory_space<vmem>>, vector<1x128xf32>
    %12 = vector.broadcast %11 : vector<1x128xf32> to vector<64x128xf32>
    %13 = arith.addf %10, %12 : vector<64x128xf32>
    %cst_9 = arith.constant 0.000000e+00 : f32
    %14 = vector.broadcast %cst_9 : f32 to vector<8x32xf32>
    %cst_10 = arith.constant 0.000000e+00 : f32
    %15 = vector.broadcast %cst_10 : f32 to vector<8x32xf32>
    %16 = vector.extract_strided_slice %13 {offsets = [0, 0], sizes = [8, 128], strides = [1, 1]} : vector<64x128xf32> to vector<8x128xf32>
    %cst_11 = arith.constant dense<0.000000e+00> : vector<8x128xf32>
    %17 = tpu.matmul %14, %0, %cst_11 {dimension_numbers = #tpu.dot_dimension_numbers<[1], [0], [0], [1], [0, 0, 1, 1], [], []>} : vector<8x32xf32>, vector<32x128xf32>, vector<8x128xf32> -> vector<8x128xf32>
    %18 = arith.addf %16, %17 : vector<8x128xf32>
    %19 = arith.negf %18 : vector<8x128xf32>
    %20 = math.exp %19 : vector<8x128xf32>
    %cst_12 = arith.constant 1.000000e+00 : f32
    %21 = vector.broadcast %cst_12 : f32 to vector<8x128xf32>
    %22 = arith.addf %21, %20 : vector<8x128xf32>
    %23 = arith.divf %21, %22 : vector<8x128xf32>
    %24 = math.tanh %18 : vector<8x128xf32>
    %25 = arith.select %7, %23, %24 : vector<8x128xi1>, vector<8x128xf32>
    %26 = vector.extract_strided_slice %25 {offsets = [0, 0], sizes = [8, 32], strides = [1, 1]} : vector<8x128xf32> to vector<8x32xf32>
    %27 = vector.extract_strided_slice %25 {offsets = [0, 32], sizes = [8, 32], strides = [1, 1]} : vector<8x128xf32> to vector<8x32xf32>
    %28 = vector.extract_strided_slice %25 {offsets = [0, 64], sizes = [8, 32], strides = [1, 1]} : vector<8x128xf32> to vector<8x32xf32>
    %29 = vector.extract_strided_slice %25 {offsets = [0, 96], sizes = [8, 32], strides = [1, 1]} : vector<8x128xf32> to vector<8x32xf32>
    %30 = arith.mulf %27, %15 : vector<8x32xf32>
    %31 = arith.mulf %26, %28 : vector<8x32xf32>
    %32 = arith.addf %30, %31 : vector<8x32xf32>
    %33 = math.tanh %32 : vector<8x32xf32>
    %34 = arith.mulf %29, %33 : vector<8x32xf32>
    %35 = vector.extract_strided_slice %13 {offsets = [8, 0], sizes = [8, 128], strides = [1, 1]} : vector<64x128xf32> to vector<8x128xf32>
    %cst_13 = arith.constant dense<0.000000e+00> : vector<8x128xf32>
    %36 = tpu.matmul %34, %0, %cst_13 {dimension_numbers = #tpu.dot_dimension_numbers<[1], [0], [0], [1], [0, 0, 1, 1], [], []>} : vector<8x32xf32>, vector<32x128xf32>, vector<8x128xf32> -> vector<8x128xf32>
    %37 = arith.addf %35, %36 : vector<8x128xf32>
    %38 = arith.negf %37 : vector<8x128xf32>
    %39 = math.exp %38 : vector<8x128xf32>
    %cst_14 = arith.constant 1.000000e+00 : f32
    %40 = vector.broadcast %cst_14 : f32 to vector<8x128xf32>
    %41 = arith.addf %40, %39 : vector<8x128xf32>
    %42 = arith.divf %40, %41 : vector<8x128xf32>
    %43 = math.tanh %37 : vector<8x128xf32>
    %44 = arith.select %7, %42, %43 : vector<8x128xi1>, vector<8x128xf32>
    %45 = vector.extract_strided_slice %44 {offsets = [0, 0], sizes = [8, 32], strides = [1, 1]} : vector<8x128xf32> to vector<8x32xf32>
    %46 = vector.extract_strided_slice %44 {offsets = [0, 32], sizes = [8, 32], strides = [1, 1]} : vector<8x128xf32> to vector<8x32xf32>
    %47 = vector.extract_strided_slice %44 {offsets = [0, 64], sizes = [8, 32], strides = [1, 1]} : vector<8x128xf32> to vector<8x32xf32>
    %48 = vector.extract_strided_slice %44 {offsets = [0, 96], sizes = [8, 32], strides = [1, 1]} : vector<8x128xf32> to vector<8x32xf32>
    %49 = arith.mulf %46, %32 : vector<8x32xf32>
    %50 = arith.mulf %45, %47 : vector<8x32xf32>
    %51 = arith.addf %49, %50 : vector<8x32xf32>
    %52 = math.tanh %51 : vector<8x32xf32>
    %53 = arith.mulf %48, %52 : vector<8x32xf32>
    %54 = vector.extract_strided_slice %13 {offsets = [16, 0], sizes = [8, 128], strides = [1, 1]} : vector<64x128xf32> to vector<8x128xf32>
    %cst_15 = arith.constant dense<0.000000e+00> : vector<8x128xf32>
    %55 = tpu.matmul %53, %0, %cst_15 {dimension_numbers = #tpu.dot_dimension_numbers<[1], [0], [0], [1], [0, 0, 1, 1], [], []>} : vector<8x32xf32>, vector<32x128xf32>, vector<8x128xf32> -> vector<8x128xf32>
    %56 = arith.addf %54, %55 : vector<8x128xf32>
    %57 = arith.negf %56 : vector<8x128xf32>
    %58 = math.exp %57 : vector<8x128xf32>
    %cst_16 = arith.constant 1.000000e+00 : f32
    %59 = vector.broadcast %cst_16 : f32 to vector<8x128xf32>
    %60 = arith.addf %59, %58 : vector<8x128xf32>
    %61 = arith.divf %59, %60 : vector<8x128xf32>
    %62 = math.tanh %56 : vector<8x128xf32>
    %63 = arith.select %7, %61, %62 : vector<8x128xi1>, vector<8x128xf32>
    %64 = vector.extract_strided_slice %63 {offsets = [0, 0], sizes = [8, 32], strides = [1, 1]} : vector<8x128xf32> to vector<8x32xf32>
    %65 = vector.extract_strided_slice %63 {offsets = [0, 32], sizes = [8, 32], strides = [1, 1]} : vector<8x128xf32> to vector<8x32xf32>
    %66 = vector.extract_strided_slice %63 {offsets = [0, 64], sizes = [8, 32], strides = [1, 1]} : vector<8x128xf32> to vector<8x32xf32>
    %67 = vector.extract_strided_slice %63 {offsets = [0, 96], sizes = [8, 32], strides = [1, 1]} : vector<8x128xf32> to vector<8x32xf32>
    %68 = arith.mulf %65, %51 : vector<8x32xf32>
    %69 = arith.mulf %64, %66 : vector<8x32xf32>
    %70 = arith.addf %68, %69 : vector<8x32xf32>
    %71 = math.tanh %70 : vector<8x32xf32>
    %72 = arith.mulf %67, %71 : vector<8x32xf32>
    %73 = vector.extract_strided_slice %13 {offsets = [24, 0], sizes = [8, 128], strides = [1, 1]} : vector<64x128xf32> to vector<8x128xf32>
    %cst_17 = arith.constant dense<0.000000e+00> : vector<8x128xf32>
    %74 = tpu.matmul %72, %0, %cst_17 {dimension_numbers = #tpu.dot_dimension_numbers<[1], [0], [0], [1], [0, 0, 1, 1], [], []>} : vector<8x32xf32>, vector<32x128xf32>, vector<8x128xf32> -> vector<8x128xf32>
    %75 = arith.addf %73, %74 : vector<8x128xf32>
    %76 = arith.negf %75 : vector<8x128xf32>
    %77 = math.exp %76 : vector<8x128xf32>
    %cst_18 = arith.constant 1.000000e+00 : f32
    %78 = vector.broadcast %cst_18 : f32 to vector<8x128xf32>
    %79 = arith.addf %78, %77 : vector<8x128xf32>
    %80 = arith.divf %78, %79 : vector<8x128xf32>
    %81 = math.tanh %75 : vector<8x128xf32>
    %82 = arith.select %7, %80, %81 : vector<8x128xi1>, vector<8x128xf32>
    %83 = vector.extract_strided_slice %82 {offsets = [0, 0], sizes = [8, 32], strides = [1, 1]} : vector<8x128xf32> to vector<8x32xf32>
    %84 = vector.extract_strided_slice %82 {offsets = [0, 32], sizes = [8, 32], strides = [1, 1]} : vector<8x128xf32> to vector<8x32xf32>
    %85 = vector.extract_strided_slice %82 {offsets = [0, 64], sizes = [8, 32], strides = [1, 1]} : vector<8x128xf32> to vector<8x32xf32>
    %86 = vector.extract_strided_slice %82 {offsets = [0, 96], sizes = [8, 32], strides = [1, 1]} : vector<8x128xf32> to vector<8x32xf32>
    %87 = arith.mulf %84, %70 : vector<8x32xf32>
    %88 = arith.mulf %83, %85 : vector<8x32xf32>
    %89 = arith.addf %87, %88 : vector<8x32xf32>
    %90 = math.tanh %89 : vector<8x32xf32>
    %91 = arith.mulf %86, %90 : vector<8x32xf32>
    %92 = vector.extract_strided_slice %13 {offsets = [32, 0], sizes = [8, 128], strides = [1, 1]} : vector<64x128xf32> to vector<8x128xf32>
    %cst_19 = arith.constant dense<0.000000e+00> : vector<8x128xf32>
    %93 = tpu.matmul %91, %0, %cst_19 {dimension_numbers = #tpu.dot_dimension_numbers<[1], [0], [0], [1], [0, 0, 1, 1], [], []>} : vector<8x32xf32>, vector<32x128xf32>, vector<8x128xf32> -> vector<8x128xf32>
    %94 = arith.addf %92, %93 : vector<8x128xf32>
    %95 = arith.negf %94 : vector<8x128xf32>
    %96 = math.exp %95 : vector<8x128xf32>
    %cst_20 = arith.constant 1.000000e+00 : f32
    %97 = vector.broadcast %cst_20 : f32 to vector<8x128xf32>
    %98 = arith.addf %97, %96 : vector<8x128xf32>
    %99 = arith.divf %97, %98 : vector<8x128xf32>
    %100 = math.tanh %94 : vector<8x128xf32>
    %101 = arith.select %7, %99, %100 : vector<8x128xi1>, vector<8x128xf32>
    %102 = vector.extract_strided_slice %101 {offsets = [0, 0], sizes = [8, 32], strides = [1, 1]} : vector<8x128xf32> to vector<8x32xf32>
    %103 = vector.extract_strided_slice %101 {offsets = [0, 32], sizes = [8, 32], strides = [1, 1]} : vector<8x128xf32> to vector<8x32xf32>
    %104 = vector.extract_strided_slice %101 {offsets = [0, 64], sizes = [8, 32], strides = [1, 1]} : vector<8x128xf32> to vector<8x32xf32>
    %105 = vector.extract_strided_slice %101 {offsets = [0, 96], sizes = [8, 32], strides = [1, 1]} : vector<8x128xf32> to vector<8x32xf32>
    %106 = arith.mulf %103, %89 : vector<8x32xf32>
    %107 = arith.mulf %102, %104 : vector<8x32xf32>
    %108 = arith.addf %106, %107 : vector<8x32xf32>
    %109 = math.tanh %108 : vector<8x32xf32>
    %110 = arith.mulf %105, %109 : vector<8x32xf32>
    %111 = vector.extract_strided_slice %13 {offsets = [40, 0], sizes = [8, 128], strides = [1, 1]} : vector<64x128xf32> to vector<8x128xf32>
    %cst_21 = arith.constant dense<0.000000e+00> : vector<8x128xf32>
    %112 = tpu.matmul %110, %0, %cst_21 {dimension_numbers = #tpu.dot_dimension_numbers<[1], [0], [0], [1], [0, 0, 1, 1], [], []>} : vector<8x32xf32>, vector<32x128xf32>, vector<8x128xf32> -> vector<8x128xf32>
    %113 = arith.addf %111, %112 : vector<8x128xf32>
    %114 = arith.negf %113 : vector<8x128xf32>
    %115 = math.exp %114 : vector<8x128xf32>
    %cst_22 = arith.constant 1.000000e+00 : f32
    %116 = vector.broadcast %cst_22 : f32 to vector<8x128xf32>
    %117 = arith.addf %116, %115 : vector<8x128xf32>
    %118 = arith.divf %116, %117 : vector<8x128xf32>
    %119 = math.tanh %113 : vector<8x128xf32>
    %120 = arith.select %7, %118, %119 : vector<8x128xi1>, vector<8x128xf32>
    %121 = vector.extract_strided_slice %120 {offsets = [0, 0], sizes = [8, 32], strides = [1, 1]} : vector<8x128xf32> to vector<8x32xf32>
    %122 = vector.extract_strided_slice %120 {offsets = [0, 32], sizes = [8, 32], strides = [1, 1]} : vector<8x128xf32> to vector<8x32xf32>
    %123 = vector.extract_strided_slice %120 {offsets = [0, 64], sizes = [8, 32], strides = [1, 1]} : vector<8x128xf32> to vector<8x32xf32>
    %124 = vector.extract_strided_slice %120 {offsets = [0, 96], sizes = [8, 32], strides = [1, 1]} : vector<8x128xf32> to vector<8x32xf32>
    %125 = arith.mulf %122, %108 : vector<8x32xf32>
    %126 = arith.mulf %121, %123 : vector<8x32xf32>
    %127 = arith.addf %125, %126 : vector<8x32xf32>
    %128 = math.tanh %127 : vector<8x32xf32>
    %129 = arith.mulf %124, %128 : vector<8x32xf32>
    %130 = vector.extract_strided_slice %13 {offsets = [48, 0], sizes = [8, 128], strides = [1, 1]} : vector<64x128xf32> to vector<8x128xf32>
    %cst_23 = arith.constant dense<0.000000e+00> : vector<8x128xf32>
    %131 = tpu.matmul %129, %0, %cst_23 {dimension_numbers = #tpu.dot_dimension_numbers<[1], [0], [0], [1], [0, 0, 1, 1], [], []>} : vector<8x32xf32>, vector<32x128xf32>, vector<8x128xf32> -> vector<8x128xf32>
    %132 = arith.addf %130, %131 : vector<8x128xf32>
    %133 = arith.negf %132 : vector<8x128xf32>
    %134 = math.exp %133 : vector<8x128xf32>
    %cst_24 = arith.constant 1.000000e+00 : f32
    %135 = vector.broadcast %cst_24 : f32 to vector<8x128xf32>
    %136 = arith.addf %135, %134 : vector<8x128xf32>
    %137 = arith.divf %135, %136 : vector<8x128xf32>
    %138 = math.tanh %132 : vector<8x128xf32>
    %139 = arith.select %7, %137, %138 : vector<8x128xi1>, vector<8x128xf32>
    %140 = vector.extract_strided_slice %139 {offsets = [0, 0], sizes = [8, 32], strides = [1, 1]} : vector<8x128xf32> to vector<8x32xf32>
    %141 = vector.extract_strided_slice %139 {offsets = [0, 32], sizes = [8, 32], strides = [1, 1]} : vector<8x128xf32> to vector<8x32xf32>
    %142 = vector.extract_strided_slice %139 {offsets = [0, 64], sizes = [8, 32], strides = [1, 1]} : vector<8x128xf32> to vector<8x32xf32>
    %143 = vector.extract_strided_slice %139 {offsets = [0, 96], sizes = [8, 32], strides = [1, 1]} : vector<8x128xf32> to vector<8x32xf32>
    %144 = arith.mulf %141, %127 : vector<8x32xf32>
    %145 = arith.mulf %140, %142 : vector<8x32xf32>
    %146 = arith.addf %144, %145 : vector<8x32xf32>
    %147 = math.tanh %146 : vector<8x32xf32>
    %148 = arith.mulf %143, %147 : vector<8x32xf32>
    %149 = vector.extract_strided_slice %13 {offsets = [56, 0], sizes = [8, 128], strides = [1, 1]} : vector<64x128xf32> to vector<8x128xf32>
    %cst_25 = arith.constant dense<0.000000e+00> : vector<8x128xf32>
    %150 = tpu.matmul %148, %0, %cst_25 {dimension_numbers = #tpu.dot_dimension_numbers<[1], [0], [0], [1], [0, 0, 1, 1], [], []>} : vector<8x32xf32>, vector<32x128xf32>, vector<8x128xf32> -> vector<8x128xf32>
    %151 = arith.addf %149, %150 : vector<8x128xf32>
    %152 = arith.negf %151 : vector<8x128xf32>
    %153 = math.exp %152 : vector<8x128xf32>
    %cst_26 = arith.constant 1.000000e+00 : f32
    %154 = vector.broadcast %cst_26 : f32 to vector<8x128xf32>
    %155 = arith.addf %154, %153 : vector<8x128xf32>
    %156 = arith.divf %154, %155 : vector<8x128xf32>
    %157 = math.tanh %151 : vector<8x128xf32>
    %158 = arith.select %7, %156, %157 : vector<8x128xi1>, vector<8x128xf32>
    %159 = vector.extract_strided_slice %158 {offsets = [0, 0], sizes = [8, 32], strides = [1, 1]} : vector<8x128xf32> to vector<8x32xf32>
    %160 = vector.extract_strided_slice %158 {offsets = [0, 32], sizes = [8, 32], strides = [1, 1]} : vector<8x128xf32> to vector<8x32xf32>
    %161 = vector.extract_strided_slice %158 {offsets = [0, 64], sizes = [8, 32], strides = [1, 1]} : vector<8x128xf32> to vector<8x32xf32>
    %162 = vector.extract_strided_slice %158 {offsets = [0, 96], sizes = [8, 32], strides = [1, 1]} : vector<8x128xf32> to vector<8x32xf32>
    %163 = arith.mulf %160, %146 : vector<8x32xf32>
    %164 = arith.mulf %159, %161 : vector<8x32xf32>
    %165 = arith.addf %163, %164 : vector<8x32xf32>
    %166 = math.tanh %165 : vector<8x32xf32>
    %167 = arith.mulf %162, %166 : vector<8x32xf32>
    %168 = tpu.concatenate %34, %53, %72, %91, %110, %129, %148, %167 in 0 : vector<8x32xf32>, vector<8x32xf32>, vector<8x32xf32>, vector<8x32xf32>, vector<8x32xf32>, vector<8x32xf32>, vector<8x32xf32>, vector<8x32xf32> -> vector<64x32xf32>
    %c0_27 = arith.constant 0 : index
    %c0_28 = arith.constant 0 : index
    %169 = vector.load %arg4[%c0_27, %c0_28] : memref<32x128xf32, #tpu.memory_space<vmem>>, vector<32x128xf32>
    %cst_29 = arith.constant dense<0.000000e+00> : vector<64x128xf32>
    %170 = tpu.matmul %168, %169, %cst_29 {dimension_numbers = #tpu.dot_dimension_numbers<[1], [0], [0], [1], [0, 0, 1, 1], [], []>} : vector<64x32xf32>, vector<32x128xf32>, vector<64x128xf32> -> vector<64x128xf32>
    %c0_30 = arith.constant 0 : index
    %c0_31 = arith.constant 0 : index
    %171 = vector.load %arg6[%c0_30, %c0_31] : memref<1x128xf32, #tpu.memory_space<vmem>>, vector<1x128xf32>
    %172 = vector.broadcast %171 : vector<1x128xf32> to vector<64x128xf32>
    %173 = arith.addf %170, %172 : vector<64x128xf32>
    %cst_32 = arith.constant 0.000000e+00 : f32
    %174 = vector.broadcast %cst_32 : f32 to vector<8x32xf32>
    %cst_33 = arith.constant 0.000000e+00 : f32
    %175 = vector.broadcast %cst_33 : f32 to vector<8x32xf32>
    %176 = vector.extract_strided_slice %173 {offsets = [0, 0], sizes = [8, 128], strides = [1, 1]} : vector<64x128xf32> to vector<8x128xf32>
    %cst_34 = arith.constant dense<0.000000e+00> : vector<8x128xf32>
    %177 = tpu.matmul %174, %1, %cst_34 {dimension_numbers = #tpu.dot_dimension_numbers<[1], [0], [0], [1], [0, 0, 1, 1], [], []>} : vector<8x32xf32>, vector<32x128xf32>, vector<8x128xf32> -> vector<8x128xf32>
    %178 = arith.addf %176, %177 : vector<8x128xf32>
    %179 = arith.negf %178 : vector<8x128xf32>
    %180 = math.exp %179 : vector<8x128xf32>
    %cst_35 = arith.constant 1.000000e+00 : f32
    %181 = vector.broadcast %cst_35 : f32 to vector<8x128xf32>
    %182 = arith.addf %181, %180 : vector<8x128xf32>
    %183 = arith.divf %181, %182 : vector<8x128xf32>
    %184 = math.tanh %178 : vector<8x128xf32>
    %185 = arith.select %7, %183, %184 : vector<8x128xi1>, vector<8x128xf32>
    %186 = vector.extract_strided_slice %185 {offsets = [0, 0], sizes = [8, 32], strides = [1, 1]} : vector<8x128xf32> to vector<8x32xf32>
    %187 = vector.extract_strided_slice %185 {offsets = [0, 32], sizes = [8, 32], strides = [1, 1]} : vector<8x128xf32> to vector<8x32xf32>
    %188 = vector.extract_strided_slice %185 {offsets = [0, 64], sizes = [8, 32], strides = [1, 1]} : vector<8x128xf32> to vector<8x32xf32>
    %189 = vector.extract_strided_slice %185 {offsets = [0, 96], sizes = [8, 32], strides = [1, 1]} : vector<8x128xf32> to vector<8x32xf32>
    %190 = arith.mulf %187, %175 : vector<8x32xf32>
    %191 = arith.mulf %186, %188 : vector<8x32xf32>
    %192 = arith.addf %190, %191 : vector<8x32xf32>
    %193 = math.tanh %192 : vector<8x32xf32>
    %194 = arith.mulf %189, %193 : vector<8x32xf32>
    %195 = vector.extract_strided_slice %173 {offsets = [8, 0], sizes = [8, 128], strides = [1, 1]} : vector<64x128xf32> to vector<8x128xf32>
    %cst_36 = arith.constant dense<0.000000e+00> : vector<8x128xf32>
    %196 = tpu.matmul %194, %1, %cst_36 {dimension_numbers = #tpu.dot_dimension_numbers<[1], [0], [0], [1], [0, 0, 1, 1], [], []>} : vector<8x32xf32>, vector<32x128xf32>, vector<8x128xf32> -> vector<8x128xf32>
    %197 = arith.addf %195, %196 : vector<8x128xf32>
    %198 = arith.negf %197 : vector<8x128xf32>
    %199 = math.exp %198 : vector<8x128xf32>
    %cst_37 = arith.constant 1.000000e+00 : f32
    %200 = vector.broadcast %cst_37 : f32 to vector<8x128xf32>
    %201 = arith.addf %200, %199 : vector<8x128xf32>
    %202 = arith.divf %200, %201 : vector<8x128xf32>
    %203 = math.tanh %197 : vector<8x128xf32>
    %204 = arith.select %7, %202, %203 : vector<8x128xi1>, vector<8x128xf32>
    %205 = vector.extract_strided_slice %204 {offsets = [0, 0], sizes = [8, 32], strides = [1, 1]} : vector<8x128xf32> to vector<8x32xf32>
    %206 = vector.extract_strided_slice %204 {offsets = [0, 32], sizes = [8, 32], strides = [1, 1]} : vector<8x128xf32> to vector<8x32xf32>
    %207 = vector.extract_strided_slice %204 {offsets = [0, 64], sizes = [8, 32], strides = [1, 1]} : vector<8x128xf32> to vector<8x32xf32>
    %208 = vector.extract_strided_slice %204 {offsets = [0, 96], sizes = [8, 32], strides = [1, 1]} : vector<8x128xf32> to vector<8x32xf32>
    %209 = arith.mulf %206, %192 : vector<8x32xf32>
    %210 = arith.mulf %205, %207 : vector<8x32xf32>
    %211 = arith.addf %209, %210 : vector<8x32xf32>
    %212 = math.tanh %211 : vector<8x32xf32>
    %213 = arith.mulf %208, %212 : vector<8x32xf32>
    %214 = vector.extract_strided_slice %173 {offsets = [16, 0], sizes = [8, 128], strides = [1, 1]} : vector<64x128xf32> to vector<8x128xf32>
    %cst_38 = arith.constant dense<0.000000e+00> : vector<8x128xf32>
    %215 = tpu.matmul %213, %1, %cst_38 {dimension_numbers = #tpu.dot_dimension_numbers<[1], [0], [0], [1], [0, 0, 1, 1], [], []>} : vector<8x32xf32>, vector<32x128xf32>, vector<8x128xf32> -> vector<8x128xf32>
    %216 = arith.addf %214, %215 : vector<8x128xf32>
    %217 = arith.negf %216 : vector<8x128xf32>
    %218 = math.exp %217 : vector<8x128xf32>
    %cst_39 = arith.constant 1.000000e+00 : f32
    %219 = vector.broadcast %cst_39 : f32 to vector<8x128xf32>
    %220 = arith.addf %219, %218 : vector<8x128xf32>
    %221 = arith.divf %219, %220 : vector<8x128xf32>
    %222 = math.tanh %216 : vector<8x128xf32>
    %223 = arith.select %7, %221, %222 : vector<8x128xi1>, vector<8x128xf32>
    %224 = vector.extract_strided_slice %223 {offsets = [0, 0], sizes = [8, 32], strides = [1, 1]} : vector<8x128xf32> to vector<8x32xf32>
    %225 = vector.extract_strided_slice %223 {offsets = [0, 32], sizes = [8, 32], strides = [1, 1]} : vector<8x128xf32> to vector<8x32xf32>
    %226 = vector.extract_strided_slice %223 {offsets = [0, 64], sizes = [8, 32], strides = [1, 1]} : vector<8x128xf32> to vector<8x32xf32>
    %227 = vector.extract_strided_slice %223 {offsets = [0, 96], sizes = [8, 32], strides = [1, 1]} : vector<8x128xf32> to vector<8x32xf32>
    %228 = arith.mulf %225, %211 : vector<8x32xf32>
    %229 = arith.mulf %224, %226 : vector<8x32xf32>
    %230 = arith.addf %228, %229 : vector<8x32xf32>
    %231 = math.tanh %230 : vector<8x32xf32>
    %232 = arith.mulf %227, %231 : vector<8x32xf32>
    %233 = vector.extract_strided_slice %173 {offsets = [24, 0], sizes = [8, 128], strides = [1, 1]} : vector<64x128xf32> to vector<8x128xf32>
    %cst_40 = arith.constant dense<0.000000e+00> : vector<8x128xf32>
    %234 = tpu.matmul %232, %1, %cst_40 {dimension_numbers = #tpu.dot_dimension_numbers<[1], [0], [0], [1], [0, 0, 1, 1], [], []>} : vector<8x32xf32>, vector<32x128xf32>, vector<8x128xf32> -> vector<8x128xf32>
    %235 = arith.addf %233, %234 : vector<8x128xf32>
    %236 = arith.negf %235 : vector<8x128xf32>
    %237 = math.exp %236 : vector<8x128xf32>
    %cst_41 = arith.constant 1.000000e+00 : f32
    %238 = vector.broadcast %cst_41 : f32 to vector<8x128xf32>
    %239 = arith.addf %238, %237 : vector<8x128xf32>
    %240 = arith.divf %238, %239 : vector<8x128xf32>
    %241 = math.tanh %235 : vector<8x128xf32>
    %242 = arith.select %7, %240, %241 : vector<8x128xi1>, vector<8x128xf32>
    %243 = vector.extract_strided_slice %242 {offsets = [0, 0], sizes = [8, 32], strides = [1, 1]} : vector<8x128xf32> to vector<8x32xf32>
    %244 = vector.extract_strided_slice %242 {offsets = [0, 32], sizes = [8, 32], strides = [1, 1]} : vector<8x128xf32> to vector<8x32xf32>
    %245 = vector.extract_strided_slice %242 {offsets = [0, 64], sizes = [8, 32], strides = [1, 1]} : vector<8x128xf32> to vector<8x32xf32>
    %246 = vector.extract_strided_slice %242 {offsets = [0, 96], sizes = [8, 32], strides = [1, 1]} : vector<8x128xf32> to vector<8x32xf32>
    %247 = arith.mulf %244, %230 : vector<8x32xf32>
    %248 = arith.mulf %243, %245 : vector<8x32xf32>
    %249 = arith.addf %247, %248 : vector<8x32xf32>
    %250 = math.tanh %249 : vector<8x32xf32>
    %251 = arith.mulf %246, %250 : vector<8x32xf32>
    %252 = vector.extract_strided_slice %173 {offsets = [32, 0], sizes = [8, 128], strides = [1, 1]} : vector<64x128xf32> to vector<8x128xf32>
    %cst_42 = arith.constant dense<0.000000e+00> : vector<8x128xf32>
    %253 = tpu.matmul %251, %1, %cst_42 {dimension_numbers = #tpu.dot_dimension_numbers<[1], [0], [0], [1], [0, 0, 1, 1], [], []>} : vector<8x32xf32>, vector<32x128xf32>, vector<8x128xf32> -> vector<8x128xf32>
    %254 = arith.addf %252, %253 : vector<8x128xf32>
    %255 = arith.negf %254 : vector<8x128xf32>
    %256 = math.exp %255 : vector<8x128xf32>
    %cst_43 = arith.constant 1.000000e+00 : f32
    %257 = vector.broadcast %cst_43 : f32 to vector<8x128xf32>
    %258 = arith.addf %257, %256 : vector<8x128xf32>
    %259 = arith.divf %257, %258 : vector<8x128xf32>
    %260 = math.tanh %254 : vector<8x128xf32>
    %261 = arith.select %7, %259, %260 : vector<8x128xi1>, vector<8x128xf32>
    %262 = vector.extract_strided_slice %261 {offsets = [0, 0], sizes = [8, 32], strides = [1, 1]} : vector<8x128xf32> to vector<8x32xf32>
    %263 = vector.extract_strided_slice %261 {offsets = [0, 32], sizes = [8, 32], strides = [1, 1]} : vector<8x128xf32> to vector<8x32xf32>
    %264 = vector.extract_strided_slice %261 {offsets = [0, 64], sizes = [8, 32], strides = [1, 1]} : vector<8x128xf32> to vector<8x32xf32>
    %265 = vector.extract_strided_slice %261 {offsets = [0, 96], sizes = [8, 32], strides = [1, 1]} : vector<8x128xf32> to vector<8x32xf32>
    %266 = arith.mulf %263, %249 : vector<8x32xf32>
    %267 = arith.mulf %262, %264 : vector<8x32xf32>
    %268 = arith.addf %266, %267 : vector<8x32xf32>
    %269 = math.tanh %268 : vector<8x32xf32>
    %270 = arith.mulf %265, %269 : vector<8x32xf32>
    %271 = vector.extract_strided_slice %173 {offsets = [40, 0], sizes = [8, 128], strides = [1, 1]} : vector<64x128xf32> to vector<8x128xf32>
    %cst_44 = arith.constant dense<0.000000e+00> : vector<8x128xf32>
    %272 = tpu.matmul %270, %1, %cst_44 {dimension_numbers = #tpu.dot_dimension_numbers<[1], [0], [0], [1], [0, 0, 1, 1], [], []>} : vector<8x32xf32>, vector<32x128xf32>, vector<8x128xf32> -> vector<8x128xf32>
    %273 = arith.addf %271, %272 : vector<8x128xf32>
    %274 = arith.negf %273 : vector<8x128xf32>
    %275 = math.exp %274 : vector<8x128xf32>
    %cst_45 = arith.constant 1.000000e+00 : f32
    %276 = vector.broadcast %cst_45 : f32 to vector<8x128xf32>
    %277 = arith.addf %276, %275 : vector<8x128xf32>
    %278 = arith.divf %276, %277 : vector<8x128xf32>
    %279 = math.tanh %273 : vector<8x128xf32>
    %280 = arith.select %7, %278, %279 : vector<8x128xi1>, vector<8x128xf32>
    %281 = vector.extract_strided_slice %280 {offsets = [0, 0], sizes = [8, 32], strides = [1, 1]} : vector<8x128xf32> to vector<8x32xf32>
    %282 = vector.extract_strided_slice %280 {offsets = [0, 32], sizes = [8, 32], strides = [1, 1]} : vector<8x128xf32> to vector<8x32xf32>
    %283 = vector.extract_strided_slice %280 {offsets = [0, 64], sizes = [8, 32], strides = [1, 1]} : vector<8x128xf32> to vector<8x32xf32>
    %284 = vector.extract_strided_slice %280 {offsets = [0, 96], sizes = [8, 32], strides = [1, 1]} : vector<8x128xf32> to vector<8x32xf32>
    %285 = arith.mulf %282, %268 : vector<8x32xf32>
    %286 = arith.mulf %281, %283 : vector<8x32xf32>
    %287 = arith.addf %285, %286 : vector<8x32xf32>
    %288 = math.tanh %287 : vector<8x32xf32>
    %289 = arith.mulf %284, %288 : vector<8x32xf32>
    %290 = vector.extract_strided_slice %173 {offsets = [48, 0], sizes = [8, 128], strides = [1, 1]} : vector<64x128xf32> to vector<8x128xf32>
    %cst_46 = arith.constant dense<0.000000e+00> : vector<8x128xf32>
    %291 = tpu.matmul %289, %1, %cst_46 {dimension_numbers = #tpu.dot_dimension_numbers<[1], [0], [0], [1], [0, 0, 1, 1], [], []>} : vector<8x32xf32>, vector<32x128xf32>, vector<8x128xf32> -> vector<8x128xf32>
    %292 = arith.addf %290, %291 : vector<8x128xf32>
    %293 = arith.negf %292 : vector<8x128xf32>
    %294 = math.exp %293 : vector<8x128xf32>
    %cst_47 = arith.constant 1.000000e+00 : f32
    %295 = vector.broadcast %cst_47 : f32 to vector<8x128xf32>
    %296 = arith.addf %295, %294 : vector<8x128xf32>
    %297 = arith.divf %295, %296 : vector<8x128xf32>
    %298 = math.tanh %292 : vector<8x128xf32>
    %299 = arith.select %7, %297, %298 : vector<8x128xi1>, vector<8x128xf32>
    %300 = vector.extract_strided_slice %299 {offsets = [0, 0], sizes = [8, 32], strides = [1, 1]} : vector<8x128xf32> to vector<8x32xf32>
    %301 = vector.extract_strided_slice %299 {offsets = [0, 32], sizes = [8, 32], strides = [1, 1]} : vector<8x128xf32> to vector<8x32xf32>
    %302 = vector.extract_strided_slice %299 {offsets = [0, 64], sizes = [8, 32], strides = [1, 1]} : vector<8x128xf32> to vector<8x32xf32>
    %303 = vector.extract_strided_slice %299 {offsets = [0, 96], sizes = [8, 32], strides = [1, 1]} : vector<8x128xf32> to vector<8x32xf32>
    %304 = arith.mulf %301, %287 : vector<8x32xf32>
    %305 = arith.mulf %300, %302 : vector<8x32xf32>
    %306 = arith.addf %304, %305 : vector<8x32xf32>
    %307 = math.tanh %306 : vector<8x32xf32>
    %308 = arith.mulf %303, %307 : vector<8x32xf32>
    %309 = vector.extract_strided_slice %173 {offsets = [56, 0], sizes = [8, 128], strides = [1, 1]} : vector<64x128xf32> to vector<8x128xf32>
    %cst_48 = arith.constant dense<0.000000e+00> : vector<8x128xf32>
    %310 = tpu.matmul %308, %1, %cst_48 {dimension_numbers = #tpu.dot_dimension_numbers<[1], [0], [0], [1], [0, 0, 1, 1], [], []>} : vector<8x32xf32>, vector<32x128xf32>, vector<8x128xf32> -> vector<8x128xf32>
    %311 = arith.addf %309, %310 : vector<8x128xf32>
    %312 = arith.negf %311 : vector<8x128xf32>
    %313 = math.exp %312 : vector<8x128xf32>
    %cst_49 = arith.constant 1.000000e+00 : f32
    %314 = vector.broadcast %cst_49 : f32 to vector<8x128xf32>
    %315 = arith.addf %314, %313 : vector<8x128xf32>
    %316 = arith.divf %314, %315 : vector<8x128xf32>
    %317 = math.tanh %311 : vector<8x128xf32>
    %318 = arith.select %7, %316, %317 : vector<8x128xi1>, vector<8x128xf32>
    %319 = vector.extract_strided_slice %318 {offsets = [0, 0], sizes = [8, 32], strides = [1, 1]} : vector<8x128xf32> to vector<8x32xf32>
    %320 = vector.extract_strided_slice %318 {offsets = [0, 32], sizes = [8, 32], strides = [1, 1]} : vector<8x128xf32> to vector<8x32xf32>
    %321 = vector.extract_strided_slice %318 {offsets = [0, 64], sizes = [8, 32], strides = [1, 1]} : vector<8x128xf32> to vector<8x32xf32>
    %322 = vector.extract_strided_slice %318 {offsets = [0, 96], sizes = [8, 32], strides = [1, 1]} : vector<8x128xf32> to vector<8x32xf32>
    %323 = arith.mulf %320, %306 : vector<8x32xf32>
    %324 = arith.mulf %319, %321 : vector<8x32xf32>
    %325 = arith.addf %323, %324 : vector<8x32xf32>
    %326 = math.tanh %325 : vector<8x32xf32>
    %327 = arith.mulf %322, %326 : vector<8x32xf32>
    %c0_50 = arith.constant 0 : index
    %c0_51 = arith.constant 0 : index
    %328 = vector.load %arg7[%c0_50, %c0_51] : memref<32x128xf32, #tpu.memory_space<vmem>>, vector<32x128xf32>
    %cst_52 = arith.constant dense<0.000000e+00> : vector<8x128xf32>
    %329 = tpu.matmul %327, %328, %cst_52 {dimension_numbers = #tpu.dot_dimension_numbers<[1], [0], [0], [1], [0, 0, 1, 1], [], []>} : vector<8x32xf32>, vector<32x128xf32>, vector<8x128xf32> -> vector<8x128xf32>
    %c0_53 = arith.constant 0 : index
    %c0_54 = arith.constant 0 : index
    %330 = vector.load %arg8[%c0_53, %c0_54] : memref<1x128xf32, #tpu.memory_space<vmem>>, vector<1x128xf32>
    %331 = vector.broadcast %330 : vector<1x128xf32> to vector<8x128xf32>
    %332 = arith.addf %329, %331 : vector<8x128xf32>
    %c0_55 = arith.constant 0 : index
    %c0_56 = arith.constant 0 : index
    %333 = vector.load %arg9[%c0_55, %c0_56] : memref<8x128xf32, #tpu.memory_space<vmem>>, vector<8x128xf32>
    tpu.vector_store %arg9[%c0_55, %c0_56], %332 {strides = array<i32>} : memref<8x128xf32, #tpu.memory_space<vmem>>, vector<8x128xf32>,
    return
  }
}

</mosaic_0001>

<bundles_post_ra>
// kernel: lstm_backbone_forward.1
= control target key start
LH: loop header
LB: loop body
LE: loop exit
PB: predicated region body
PF: predicated region fallthrough
CT: control target
= control target key end

     0   :  { %vm86_vm0 = vcmask 1043456   ;;  %vm61_vm1 = vcmask 31744   ;;  %v2638_v0 = vmov 0.0|0.0   ;;  %vm2639_vm2 = vmmov 0   ;;  %s2642_s23 = smov 32   ;;  %s3096_s2 = inlined_call_operand.vmem [shape: f32[32,128], index: 2, kind: input, shape index: {}]   ;;  %s3097_s1 = inlined_call_operand.vmem [shape: f32[4,128], index: 1, kind: input, shape index: {}]   ;;  %s3098_s0 = inlined_call_operand.vmem [shape: f32[64,4], index: 0, kind: input, shape index: {}]   ;;  %s3099_s3 = inlined_call_operand.vmem [shape: f32[1,128], index: 3, kind: input, shape index: {}]   ;;  %s3100_s4 = inlined_call_operand.vmem [shape: f32[32,128], index: 4, kind: input, shape index: {}]   ;;  %s3101_s5 = inlined_call_operand.vmem [shape: f32[32,128], index: 5, kind: input, shape index: {}]   ;;  %s3102_s6 = inlined_call_operand.vmem [shape: f32[1,128], index: 6, kind: input, shape index: {}]   ;;  %s3103_s7 = inlined_call_operand.vmem [shape: f32[32,128], index: 7, kind: input, shape index: {}]   ;;  %s3104_s8 = inlined_call_operand.vmem [shape: f32[1,128], index: 8, kind: input, shape index: {}]   ;;  %s3105_s9 = inlined_call_operand.vmem [shape: f32[8,128], index: 9, kind: output, shape index: {}]  }
   0x1   :  { %2395 = vmatprep.subr.bf16.mxu1 %v2638_v0  ;;  %v32_v1 = vld [vmem:[%s3096_s2] sm:$0xff]  ;;  %v33_v2 = vld [vmem:[%s3096_s2 + $0x8] sm:$0xff]  ;;  %v34_v7 = vld [vmem:[%s3096_s2 + $0x10] sm:$0xff]  ;;  %v2640_v8 = vmov 0.0   ;;  %v40_v20 = vlaneseq  ;;  %vm195_vm6 = vcmask 261120  }
   0x2   :  { %v53_v3 = vld [vmem:[%s3097_s1] sm:$0xf]  ;;  %v2703_v4 = vpack.c.bf16 %v33_v2, %v32_v1  ;;  %v46_v6 = vld [vmem:[%s3098_s0 + $0x8] sm:$0xff]  ;;  %2196 = vmatprep.mubr.msk.f32.mxu1 %vm2639_vm2, %v2640_v8  ;;  %v35_v9 = vld [vmem:[%s3096_s2 + $0x18] sm:$0xff] }
   0x3   :  { %2174 = vmatprep.subr.msk.mxu0 %vm86_vm0, %v53_v3  ;;  %v45_v5 = vld [vmem:[%s3098_s0] sm:$0xff]  ;;  %v2724_v10 = vpack.c.bf16 %v35_v9, %v34_v7  ;;  %v41_v22 = vand.u32 127, %v40_v20  ;;  %v47_v51 = vld [vmem:[%s3098_s0 + $0x10] sm:$0xff]  ;;  %v48_v52 = vld [vmem:[%s3098_s0 + $0x18] sm:$0xff] }
   0x4   :  { %2175 = vmatpush3.msk.msra.mxu0 %vm86_vm0, %v53_v3  ;;  %2176 = vmatprep.mubr.msk.f32.mxu0 %vm61_vm1, %v45_v5  ;;  %v2744_v12 = vld [vmem:[%s3099_s3] ss:$0 sm:$0xff]  ;;  %s2641_s3 = smov 64   ;;  %v50_v54 = vld [vmem:[%s3098_s0 + $0x28] sm:$0xff]  ;;  %v51_v55 = vld [vmem:[%s3098_s0 + $0x30] sm:$0xff] }
   0x5   :  { %2397 = vmatpush3.bf16.msra.mxu1 %v2703_v4  ;;  %2177 = vmatmul.mubr.msk.f32.vlgmr.msra.gmra.mrb[0].mxu0 %vm61_vm1, %v46_v6  ;;  %vm42_vm3 = vcmp.lt.s32.totalorder %v41_v22, 64  ;;  %vm43_vm4 = vcmp.ge.s32.totalorder %v41_v22, 96  ;;  %v49_v53 = vld [vmem:[%s3098_s0 + $0x20] sm:$0xff]  ;;  %v52_v56 = vld [vmem:[%s3098_s0 + $0x38] sm:$0xff]  ;;  %v1928_v23 = vld [vmem:[%s3103_s7 + $0x10] sm:$0xff] }
   0x6   :  { %2398 = vmatprep.subr.bf16.mxu1 %v2638_v0  ;;  %2407 = vmatprep.subr.bf16.mxu0 %v2638_v0  ;;  %vm2747_vm5 = vmor %vm42_vm3, %vm43_vm4 }
   0x7   :  { %2409 = vmatpush3.bf16.msra.mxu0 %v2703_v4  ;;  %2179 = vmatprep.mubr.msk.f32.mxu0 %vm61_vm1, %v47_v51 }
   0x8   :  { %2410 = vmatprep.subr.bf16.mxu0 %v2638_v0 }
   0x9   :  { %2400 = vmatpush3.bf16.msra.mxu1 %v2724_v10  ;;  %2180 = vmatmul.mubr.msk.f32.gmra.mrb[2].mxu0 %vm61_vm1, %v48_v52 }
   0xa   :  { %2401 = vmatprep.subr.bf16.mxu1 %v2638_v0  ;;  %2182 = vmatprep.mubr.msk.f32.mxu0 %vm61_vm1, %v49_v53 }
   0xb   :  { %2412 = vmatpush3.bf16.msra.mxu0 %v2724_v10 }
   0xc   :  { %2197 = vmatmul.mubr.f32.vlgmr.msra.gmra.mrb[0].mxu1 %v2640_v8  ;;  %2419 = vmatprep.subr.bf16.mxu0 %v2638_v0 }
   0xd   :  { %2403 = vmatpush3.bf16.msra.mxu1 %v2703_v4  ;;  %2207 = vmatprep.mubr.msk.f32.mxu1 %vm2639_vm2, %v2640_v8 }
   0xe   :  { %2404 = vmatprep.subr.bf16.mxu1 %v2638_v0  ;;  %2183 = vmatmul.mubr.msk.f32.gmra.mrb[4].mxu0 %vm61_vm1, %v50_v54 }
   0xf   :  { %2185 = vmatprep.mubr.msk.f32.mxu0 %vm61_vm1, %v51_v55 }
  0x11   :  { %2406 = vmatpush3.bf16.msra.mxu1 %v2724_v10 }
  0x12   :  { %2413 = vmatprep.subr.bf16.mxu1 %v2638_v0  ;;  %2186 = vmatmul.mubr.msk.f32.gmra.mrb[6].mxu0 %vm61_vm1, %v52_v56 }
  0x13   :  { %2218 = vmatprep.mubr.msk.f32.mxu0 %vm2639_vm2, %v2640_v8 }
  0xd8   :  { %v2178_v11 = vpop.f32.mrb[0].mxu0 }
  0xd9   :  { %v156_v13 = vpop.f32.mrb[1].mxu0  ;;  %v162_v36 = vadd.f32 %v2178_v11, %v2744_v12 }
  0xda   :  { %v157_v14 = vadd.f32 %v2744_v12, %v156_v13 }
  0xdc   :  { %v2181_v60 = vpop.f32.mrb[2].mxu0 }
  0xdd   :  { %v166_v61 = vpop.f32.mrb[3].mxu0 }
  0xde   :  { %v167_v5 = vadd.f32 %v2744_v12, %v166_v61 }
  0xdf   :  { %v265_v15 = vpop.f32.mrb[0].mxu1 }
  0xe0   :  { %v269_v16 = vadd.f32 %v265_v15, %v157_v14  ;;  %v2198_v17 = vpop.f32.mrb[1].mxu1 }
  0xe1   :  { %v2800_v62 = vpop.f32.mrb[4].mxu0 }
  0xe2   :  { %v2027_v18 = vmul.f32 -1.442695, %v269_v16  ;;  %v2802_v63 = vpop.f32.mrb[5].mxu0 }
  0xe4   :  { %2510 = vpow2.f32 %v2027_v18 }
  0xe5   :  { %2512 = vtanh.f32 %v269_v16  ;;  %v2804_v1 = vpop.f32.mrb[6].mxu0 }
  0xe6   :  { %v2806_v2 = vpop.f32.mrb[7].mxu0 }
  0xee   :  { %v2511_v19 = vpop.eup %2510 }
  0xef   :  { %v273_v21 = vadd.f32 1.0, %v2511_v19  ;;  %v2513_v24 = vpop.eup %2512 }
  0xf1   :  { %2514 = vrcp.f32 %v273_v21 }
  0xfb   :  { %v2515_v25 = vpop.eup %2514 }
  0xfc   :  { %v277_v26 = vsel %vm2747_vm5, %v2515_v25, %v2513_v24 }
  0xfd   :  { %280 = vrot.lane.b32.xlu0 %v277_v26, %s2641_s3  ;;  %v278_v29 = vmul.f32 0.0, %v277_v26 }
 0x16f   :  { %v281_v27 = vpop.permute.xlu0 %280 }
 0x170   :  { %v283_v28 = vmul.f32 %v281_v27, %v277_v26 }
 0x172   :  { %285 = vrot.lane.b32.xlu0 %v283_v28, %s2642_s23  ;;  %v172_v28 = vadd.f32 %v2181_v60, %v2744_v12 }
 0x1e4   :  { %v286_v30 = vpop.permute.xlu0 %285 }
 0x1e5   :  { %v288_v31 = vadd.f32 %v286_v30, %v278_v29 }
 0x1e7   :  { %2516 = vtanh.f32 %v288_v31 }
 0x1f1   :  { %v2517_v32 = vpop.eup %2516 }
 0x1f2   :  { %291 = vrot.lane.b32.xlu1 %v2517_v32, %s2641_s3 }
 0x264   :  { %v292_v33 = vpop.permute.xlu1 %291 }
 0x265   :  { %v294_v34 = vmul.f32 %v292_v33, %v277_v26 }
 0x267   :  { %296 = vrot.lane.b32.xlu1 %v294_v34, %s2642_s23 }
 0x2d9   :  { %v2757_v35 = vpop.permute.xlu1 %296 }
 0x2da   :  { %2208 = vmatmul.mubr.msk.f32.vlgmr.msra.gmra.mrb[2].mxu1 %vm195_vm6, %v2757_v35 }
 0x2db   :  { %2415 = vmatpush3.bf16.msra.mxu1 %v2703_v4  ;;  %2229 = vmatprep.mubr.msk.f32.mxu1 %vm2639_vm2, %v2640_v8 }
 0x2dc   :  { %2416 = vmatprep.subr.bf16.mxu1 %v2638_v0 }
 0x2df   :  { %2418 = vmatpush3.bf16.msra.mxu1 %v2724_v10 }
 0x2e0   :  { %2425 = vmatprep.subr.bf16.mxu1 %v2638_v0 }
 0x3ad   :  { %v366_v37 = vpop.f32.mrb[2].mxu1 }
 0x3ae   :  { %v370_v38 = vadd.f32 %v366_v37, %v162_v36  ;;  %v2209_v39 = vpop.f32.mrb[3].mxu1 }
 0x3b0   :  { %v2029_v40 = vmul.f32 -1.442695, %v370_v38 }
 0x3b2   :  { %2518 = vpow2.f32 %v2029_v40 }
 0x3b3   :  { %2520 = vtanh.f32 %v370_v38 }
 0x3bc   :  { %v2519_v41 = vpop.eup %2518 }
 0x3bd   :  { %v374_v42 = vadd.f32 1.0, %v2519_v41  ;;  %v2521_v43 = vpop.eup %2520 }
 0x3bf   :  { %2522 = vrcp.f32 %v374_v42 }
 0x3c9   :  { %v2523_v44 = vpop.eup %2522 }
 0x3ca   :  { %v378_v45 = vsel %vm2747_vm5, %v2523_v44, %v2521_v43 }
 0x3cb   :  { %381 = vrot.lane.b32.xlu0 %v378_v45, %s2641_s3  ;;  %v379_v48 = vmul.f32 %v378_v45, %v288_v31 }
 0x43d   :  { %v382_v46 = vpop.permute.xlu0 %381 }
 0x43e   :  { %v384_v47 = vmul.f32 %v382_v46, %v378_v45 }
 0x440   :  { %386 = vrot.lane.b32.xlu1 %v384_v47, %s2642_s23 }
 0x4b2   :  { %v387_v49 = vpop.permute.xlu1 %386 }
 0x4b3   :  { %v389_v50 = vadd.f32 %v387_v49, %v379_v48  ;;  %v177_v48 = vadd.f32 %v2744_v12, %v2802_v63 }
 0x4b5   :  { %2524 = vtanh.f32 %v389_v50 }
 0x4bf   :  { %v2525_v57 = vpop.eup %2524 }
 0x4c0   :  { %392 = vrot.lane.b32.xlu0 %v2525_v57, %s2641_s3 }
 0x532   :  { %v393_v58 = vpop.permute.xlu0 %392 }
 0x533   :  { %v395_v59 = vmul.f32 %v393_v58, %v378_v45 }
 0x535   :  { %397 = vrot.lane.b32.xlu1 %v395_v59, %s2642_s23 }
 0x5a7   :  { %v2808_v3 = vpop.permute.xlu1 %397 }
 0x5a8   :  { %2219 = vmatmul.mubr.msk.f32.vlgmr.msra.gmra.mrb[8].mxu0 %vm195_vm6, %v2808_v3 }
 0x5a9   :  { %2421 = vmatpush3.bf16.msra.mxu0 %v2703_v4  ;;  %2240 = vmatprep.mubr.msk.f32.mxu0 %vm2639_vm2, %v2640_v8 }
 0x5aa   :  { %2422 = vmatprep.subr.bf16.mxu0 %v2638_v0 }
 0x5ad   :  { %2424 = vmatpush3.bf16.msra.mxu0 %v2724_v10 }
 0x5ae   :  { %2431 = vmatprep.subr.bf16.mxu0 %v2638_v0 }
 0x67b   :  { %v467_v6 = vpop.f32.mrb[8].mxu0 }
 0x67c   :  { %v471_v7 = vadd.f32 %v467_v6, %v167_v5  ;;  %v2220_v9 = vpop.f32.mrb[9].mxu0 }
 0x67e   :  { %v2031_v11 = vmul.f32 -1.442695, %v471_v7 }
 0x680   :  { %2526 = vpow2.f32 %v2031_v11  ;;  %v182_v11 = vadd.f32 %v2800_v62, %v2744_v12 }
 0x681   :  { %2528 = vtanh.f32 %v471_v7 }
 0x68a   :  { %v2527_v13 = vpop.eup %2526 }
 0x68b   :  { %v475_v14 = vadd.f32 1.0, %v2527_v13  ;;  %v2529_v15 = vpop.eup %2528 }
 0x68d   :  { %2530 = vrcp.f32 %v475_v14 }
 0x697   :  { %v2531_v16 = vpop.eup %2530 }
 0x698   :  { %v479_v17 = vsel %vm2747_vm5, %v2531_v16, %v2529_v15 }
 0x699   :  { %482 = vrot.lane.b32.xlu0 %v479_v17, %s2641_s3  ;;  %v480_v20 = vmul.f32 %v479_v17, %v389_v50 }
 0x70b   :  { %v483_v18 = vpop.permute.xlu0 %482 }
 0x70c   :  { %v485_v19 = vmul.f32 %v483_v18, %v479_v17 }
 0x70e   :  { %487 = vrot.lane.b32.xlu1 %v485_v19, %s2642_s23 }
 0x780   :  { %v488_v21 = vpop.permute.xlu1 %487 }
 0x781   :  { %v490_v22 = vadd.f32 %v488_v21, %v480_v20 }
 0x783   :  { %2532 = vtanh.f32 %v490_v22 }
 0x78d   :  { %v2533_v24 = vpop.eup %2532 }
 0x78e   :  { %493 = vrot.lane.b32.xlu0 %v2533_v24, %s2641_s3 }
 0x800   :  { %v494_v25 = vpop.permute.xlu0 %493 }
 0x801   :  { %v496_v26 = vmul.f32 %v494_v25, %v479_v17  ;;  %v1002_v25 = vld [vmem:[%s3100_s4] sm:$0xff] }
 0x803   :  { %498 = vrot.lane.b32.xlu1 %v496_v26, %s2642_s23  ;;  %v1003_v26 = vld [vmem:[%s3100_s4 + $0x8] sm:$0xff] }
 0x875   :  { %v2825_v27 = vpop.permute.xlu1 %498 }
 0x876   :  { %2230 = vmatmul.mubr.msk.f32.vlgmr.msra.gmra.mrb[4].mxu1 %vm195_vm6, %v2825_v27 }
 0x877   :  { %2427 = vmatpush3.bf16.msra.mxu1 %v2703_v4  ;;  %2251 = vmatprep.mubr.msk.f32.mxu1 %vm2639_vm2, %v2640_v8 }
 0x878   :  { %2428 = vmatprep.subr.bf16.mxu1 %v2638_v0 }
 0x87b   :  { %2430 = vmatpush3.bf16.msra.mxu1 %v2724_v10 }
 0x87c   :  { %2437 = vmatprep.subr.bf16.mxu1 %v2638_v0 }
 0x949   :  { %v568_v29 = vpop.f32.mrb[4].mxu1 }
 0x94a   :  { %v572_v30 = vadd.f32 %v568_v29, %v172_v28  ;;  %v2231_v31 = vpop.f32.mrb[5].mxu1  ;;  %v2443_v28 = vpack.c.bf16 %v1003_v26, %v1002_v25 }
 0x94c   :  { %v2033_v32 = vmul.f32 -1.442695, %v572_v30 }
 0x94e   :  { %2534 = vpow2.f32 %v2033_v32  ;;  %v1004_v32 = vld [vmem:[%s3100_s4 + $0x10] sm:$0xff] }
 0x94f   :  { %2536 = vtanh.f32 %v572_v30 }
 0x958   :  { %v2535_v33 = vpop.eup %2534 }
 0x959   :  { %v576_v34 = vadd.f32 1.0, %v2535_v33  ;;  %v2537_v36 = vpop.eup %2536  ;;  %v1005_v33 = vld [vmem:[%s3100_s4 + $0x18] sm:$0xff] }
 0x95b   :  { %2538 = vrcp.f32 %v576_v34  ;;  %v2447_v34 = vpack.c.bf16 %v1005_v33, %v1004_v32 }
 0x965   :  { %v2539_v37 = vpop.eup %2538 }
 0x966   :  { %v580_v38 = vsel %vm2747_vm5, %v2539_v37, %v2537_v36 }
 0x967   :  { %583 = vrot.lane.b32.xlu0 %v580_v38, %s2641_s3  ;;  %v581_v41 = vmul.f32 %v580_v38, %v490_v22 }
 0x9d9   :  { %v584_v39 = vpop.permute.xlu0 %583 }
 0x9da   :  { %v586_v40 = vmul.f32 %v584_v39, %v580_v38 }
 0x9dc   :  { %588 = vrot.lane.b32.xlu1 %v586_v40, %s2642_s23 }
 0xa4e   :  { %v589_v42 = vpop.permute.xlu1 %588 }
 0xa4f   :  { %v591_v43 = vadd.f32 %v589_v42, %v581_v41 }
 0xa51   :  { %2540 = vtanh.f32 %v591_v43 }
 0xa5b   :  { %v2541_v44 = vpop.eup %2540 }
 0xa5c   :  { %594 = vrot.lane.b32.xlu0 %v2541_v44, %s2641_s3 }
 0xace   :  { %v595_v45 = vpop.permute.xlu0 %594 }
 0xacf   :  { %v597_v46 = vmul.f32 %v595_v45, %v580_v38 }
 0xad1   :  { %599 = vrot.lane.b32.xlu1 %v597_v46, %s2642_s23 }
 0xb43   :  { %v2842_v47 = vpop.permute.xlu1 %599 }
 0xb44   :  { %2241 = vmatmul.mubr.msk.f32.vlgmr.msra.gmra.mrb[10].mxu0 %vm195_vm6, %v2842_v47 }
 0xb45   :  { %2433 = vmatpush3.bf16.msra.mxu0 %v2703_v4  ;;  %2262 = vmatprep.mubr.msk.f32.mxu0 %vm2639_vm2, %v2640_v8 }
 0xb46   :  { %2434 = vmatprep.subr.bf16.mxu0 %v2638_v0 }
 0xb49   :  { %2436 = vmatpush3.bf16.msra.mxu0 %v2724_v10 }
 0xb4a   :  { %2444 = vmatprep.subr.bf16.mxu0 %v2443_v28 }
 0xc17   :  { %v669_v49 = vpop.f32.mrb[10].mxu0 }
 0xc18   :  { %v673_v50 = vadd.f32 %v669_v49, %v177_v48  ;;  %v2242_v51 = vpop.f32.mrb[11].mxu0 }
 0xc1a   :  { %v2035_v52 = vmul.f32 -1.442695, %v673_v50 }
 0xc1c   :  { %2542 = vpow2.f32 %v2035_v52 }
 0xc1d   :  { %2544 = vtanh.f32 %v673_v50 }
 0xc26   :  { %v2543_v53 = vpop.eup %2542 }
 0xc27   :  { %v677_v54 = vadd.f32 1.0, %v2543_v53  ;;  %v2545_v55 = vpop.eup %2544 }
 0xc29   :  { %2546 = vrcp.f32 %v677_v54 }
 0xc33   :  { %v2547_v56 = vpop.eup %2546 }
 0xc34   :  { %v681_v57 = vsel %vm2747_vm5, %v2547_v56, %v2545_v55  ;;  %v36_v55 = vld [vmem:[%s3101_s5] sm:$0xff]  ;;  %v37_v56 = vld [vmem:[%s3101_s5 + $0x8] sm:$0xff] }
 0xc35   :  { %684 = vrot.lane.b32.xlu0 %v681_v57, %s2641_s3  ;;  %v682_v60 = vmul.f32 %v681_v57, %v591_v43 }
 0xca7   :  { %v685_v58 = vpop.permute.xlu0 %684 }
 0xca8   :  { %v687_v59 = vmul.f32 %v685_v58, %v681_v57  ;;  %v38_v58 = vld [vmem:[%s3101_s5 + $0x10] sm:$0xff] }
 0xcaa   :  { %689 = vrot.lane.b32.xlu1 %v687_v59, %s2642_s23  ;;  %v39_v59 = vld [vmem:[%s3101_s5 + $0x18] sm:$0xff] }
 0xd1c   :  { %v690_v61 = vpop.permute.xlu1 %689 }
 0xd1d   :  { %v692_v63 = vadd.f32 %v690_v61, %v682_v60  ;;  %v2934_v60 = vpack.c.bf16 %v39_v59, %v38_v58 }
 0xd1f   :  { %2548 = vtanh.f32 %v692_v63 }
 0xd29   :  { %v2549_v5 = vpop.eup %2548 }
 0xd2a   :  { %695 = vrot.lane.b32.xlu0 %v2549_v5, %s2641_s3 }
 0xd9c   :  { %v696_v6 = vpop.permute.xlu0 %695 }
 0xd9d   :  { %v698_v7 = vmul.f32 %v696_v6, %v681_v57  ;;  %v2924_v57 = vpack.c.bf16 %v37_v56, %v36_v55  ;;  %v192_v6 = vadd.f32 %v2804_v1, %v2744_v12 }
 0xd9f   :  { %700 = vrot.lane.b32.xlu1 %v698_v7, %s2642_s23 }
 0xe11   :  { %v701_v9 = vpop.permute.xlu1 %700 }
 0xe12   :  { %2252 = vmatmul.mubr.msk.f32.vlgmr.msra.gmra.mrb[6].mxu1 %vm195_vm6, %v701_v9 }
 0xe13   :  { %2439 = vmatpush3.bf16.msra.mxu1 %v2703_v4  ;;  %2273 = vmatprep.mubr.msk.f32.mxu1 %vm2639_vm2, %v2640_v8 }
 0xe14   :  { %2440 = vmatprep.subr.bf16.mxu1 %v2638_v0 }
 0xe17   :  { %2442 = vmatpush3.bf16.msra.mxu1 %v2724_v10 }
 0xe18   :  { %2451 = vmatprep.subr.bf16.mxu1 %v2638_v0 }
 0xee5   :  { %v770_v13 = vpop.f32.mrb[6].mxu1 }
 0xee6   :  { %v774_v14 = vadd.f32 %v770_v13, %v182_v11  ;;  %v2253_v15 = vpop.f32.mrb[7].mxu1  ;;  %v2959_v13 = vld [vmem:[%s3102_s6] ss:$0 sm:$0xff] }
 0xee8   :  { %v2037_v16 = vmul.f32 -1.442695, %v774_v14 }
 0xeea   :  { %2550 = vpow2.f32 %v2037_v16 }
 0xeeb   :  { %2552 = vtanh.f32 %v774_v14 }
 0xef4   :  { %v2551_v17 = vpop.eup %2550 }
 0xef5   :  { %v778_v18 = vadd.f32 1.0, %v2551_v17  ;;  %v2553_v4 = vpop.eup %2552 }
 0xef7   :  { %2554 = vrcp.f32 %v778_v18 }
 0xf01   :  { %v2555_v19 = vpop.eup %2554 }
 0xf02   :  { %v782_v20 = vsel %vm2747_vm5, %v2555_v19, %v2553_v4 }
 0xf03   :  { %785 = vrot.lane.b32.xlu0 %v782_v20, %s2641_s3  ;;  %v783_v62 = vmul.f32 %v782_v20, %v692_v63 }
 0xf75   :  { %v786_v10 = vpop.permute.xlu0 %785 }
 0xf76   :  { %v788_v21 = vmul.f32 %v786_v10, %v782_v20 }
 0xf78   :  { %790 = vrot.lane.b32.xlu1 %v788_v21, %s2642_s23 }
 0xfea   :  { %v791_v22 = vpop.permute.xlu1 %790 }
 0xfeb   :  { %v793_v24 = vadd.f32 %v791_v22, %v783_v62 }
 0xfed   :  { %2556 = vtanh.f32 %v793_v24 }
 0xff7   :  { %v2557_v29 = vpop.eup %2556 }
 0xff8   :  { %796 = vrot.lane.b32.xlu0 %v2557_v29, %s2641_s3 }
0x106a   :  { %v797_v30 = vpop.permute.xlu0 %796 }
0x106b   :  { %v799_v31 = vmul.f32 %v797_v30, %v782_v20 }
0x106d   :  { %801 = vrot.lane.b32.xlu1 %v799_v31, %s2642_s23 }
0x10df   :  { %v802_v36 = vpop.permute.xlu1 %801 }
0x10e0   :  { %2263 = vmatmul.mubr.msk.f32.vlgmr.msra.gmra.mrb[12].mxu0 %vm195_vm6, %v802_v36 }
0x10e1   :  { %2446 = vmatpush3.bf16.msra.mxu0 %v2443_v28  ;;  %2284 = vmatprep.mubr.msk.f32.mxu0 %vm195_vm6, %v2757_v35  ;;  %v187_v35 = vadd.f32 %v2744_v12, %v2806_v2 }
0x10e2   :  { %2448 = vmatprep.subr.bf16.mxu0 %v2447_v34 }
0x10e5   :  { %2450 = vmatpush3.bf16.msra.mxu0 %v2447_v34 }
0x10e6   :  { %2463 = vmatprep.subr.bf16.mxu0 %v2638_v0 }
0x10e8   :  { %2285 = vmatmul.mubr.msk.f32.vlgmr.msra.gmra.mrb[14].mxu0 %vm195_vm6, %v2808_v3 }
0x10e9   :  { %2287 = vmatprep.mubr.msk.f32.mxu0 %vm195_vm6, %v2825_v27  ;;  %2465 = vmatpush3.bf16.msra.mxu0 %v2924_v57 }
0x10ea   :  { %2466 = vmatprep.subr.bf16.mxu0 %v2638_v0 }
0x10ec   :  { %2288 = vmatmul.mubr.msk.f32.gmra.mrb[16].mxu0 %vm195_vm6, %v2842_v47 }
0x10ed   :  { %2290 = vmatprep.mubr.msk.f32.mxu0 %vm195_vm6, %v701_v9  ;;  %2468 = vmatpush3.bf16.msra.mxu0 %v2934_v60 }
0x10ee   :  { %2475 = vmatprep.subr.bf16.mxu0 %v2638_v0 }
0x10f0   :  { %2291 = vmatmul.mubr.msk.f32.gmra.mrb[18].mxu0 %vm195_vm6, %v802_v36 }
0x11b3   :  { %v871_v37 = vpop.f32.mrb[12].mxu0 }
0x11b4   :  { %v875_v38 = vadd.f32 %v871_v37, %v187_v35  ;;  %v2264_v39 = vpop.f32.mrb[13].mxu0 }
0x11b6   :  { %v2039_v40 = vmul.f32 -1.442695, %v875_v38 }
0x11b8   :  { %2558 = vpow2.f32 %v2039_v40 }
0x11b9   :  { %2560 = vtanh.f32 %v875_v38 }
0x11bb   :  { %v2900_v41 = vpop.f32.mrb[14].mxu0 }
0x11bc   :  { %v1084_v3 = vpop.f32.mrb[15].mxu0 }
0x11bd   :  { %v1085_v14 = vadd.f32 %v2959_v13, %v1084_v3 }
0x11bf   :  { %v2902_v42 = vpop.f32.mrb[16].mxu0 }
0x11c0   :  { %v2904_v27 = vpop.f32.mrb[17].mxu0 }
0x11c2   :  { %v2559_v43 = vpop.eup %2558 }
0x11c3   :  { %v879_v44 = vadd.f32 1.0, %v2559_v43  ;;  %v2906_v45 = vpop.f32.mrb[18].mxu0  ;;  %v2561_v2 = vpop.eup %2560 }
0x11c4   :  { %v2908_v46 = vpop.f32.mrb[19].mxu0 }
0x11c5   :  { %2562 = vrcp.f32 %v879_v44 }
0x11cf   :  { %v2563_v47 = vpop.eup %2562 }
0x11d0   :  { %v883_v48 = vsel %vm2747_vm5, %v2563_v47, %v2561_v2  ;;  %v1090_v2 = vadd.f32 %v2900_v41, %v2959_v13 }
0x11d1   :  { %886 = vrot.lane.b32.xlu0 %v883_v48, %s2641_s3  ;;  %v884_v51 = vmul.f32 %v883_v48, %v793_v24 }
0x1243   :  { %v887_v49 = vpop.permute.xlu0 %886 }
0x1244   :  { %v889_v50 = vmul.f32 %v887_v49, %v883_v48 }
0x1246   :  { %891 = vrot.lane.b32.xlu1 %v889_v50, %s2642_s23 }
0x12b8   :  { %v892_v52 = vpop.permute.xlu1 %891 }
0x12b9   :  { %v2914_v53 = vadd.f32 %v892_v52, %v884_v51 }
0x12bb   :  { %2564 = vtanh.f32 %v2914_v53 }
0x12c5   :  { %v2565_v54 = vpop.eup %2564 }
0x12c6   :  { %897 = vrot.lane.b32.xlu0 %v2565_v54, %s2641_s3 }
0x1338   :  { %v898_v61 = vpop.permute.xlu0 %897 }
0x1339   :  { %v900_v63 = vmul.f32 %v898_v61, %v883_v48 }
0x133b   :  { %902 = vrot.lane.b32.xlu1 %v900_v63, %s2642_s23 }
0x13ad   :  { %v903_v5 = vpop.permute.xlu1 %902 }
0x13ae   :  { %2274 = vmatmul.mubr.msk.f32.vlgmr.msra.gmra.mrb[8].mxu1 %vm195_vm6, %v903_v5  ;;  %2293 = vmatprep.mubr.msk.f32.mxu0 %vm195_vm6, %v903_v5 }
0x13af   :  { %2453 = vmatpush3.bf16.msra.mxu1 %v2924_v57  ;;  %2304 = vmatprep.mubr.msk.f32.mxu1 %vm2639_vm2, %v2640_v8 }
0x13b0   :  { %2454 = vmatprep.subr.bf16.mxu1 %v2638_v0 }
0x13b3   :  { %2456 = vmatpush3.bf16.msra.mxu1 %v2934_v60 }
0x13b4   :  { %2457 = vmatprep.subr.bf16.mxu1 %v2638_v0 }
0x13b6   :  { %2305 = vmatmul.mubr.f32.vlgmr.msra.gmra.mrb[10].mxu1 %v2640_v8 }
0x13b7   :  { %2459 = vmatpush3.bf16.msra.mxu1 %v2924_v57  ;;  %2315 = vmatprep.mubr.msk.f32.mxu1 %vm2639_vm2, %v2640_v8 }
0x13b8   :  { %2460 = vmatprep.subr.bf16.mxu1 %v2638_v0 }
0x13bb   :  { %2462 = vmatpush3.bf16.msra.mxu1 %v2934_v60 }
0x13bc   :  { %2469 = vmatprep.subr.bf16.mxu1 %v2638_v0 }
0x1481   :  { %v972_v7 = vpop.f32.mrb[8].mxu1 }
0x1482   :  { %v976_v9 = vadd.f32 %v972_v7, %v192_v6  ;;  %v2275_v11 = vpop.f32.mrb[9].mxu1 }
0x1484   :  { %v2041_v62 = vmul.f32 -1.442695, %v976_v9 }
0x1489   :  { %v1189_v15 = vpop.f32.mrb[10].mxu1 }
0x148a   :  { %v1193_v16 = vadd.f32 %v1189_v15, %v1085_v14  ;;  %v2306_v17 = vpop.f32.mrb[11].mxu1  ;;  %v1095_v15 = vadd.f32 %v2959_v13, %v2904_v27 }
0x148c   :  { %v2051_v18 = vmul.f32 -1.442695, %v1193_v16 }
0x148e   :  { %2566 = vpow2.f32 %v2051_v18 }
0x148f   :  { %2568 = vtanh.f32 %v1193_v16 }
0x1498   :  { %v2567_v4 = vpop.eup %2566 }
0x1499   :  { %v1197_v19 = vadd.f32 1.0, %v2567_v4  ;;  %v2569_v12 = vpop.eup %2568 }
0x149b   :  { %2570 = vrcp.f32 %v1197_v19 }
0x149c   :  { %2572 = vpow2.f32 %v2041_v62 }
0x14a5   :  { %v2571_v1 = vpop.eup %2570 }
0x14a6   :  { %v1201_v20 = vsel %vm2747_vm5, %v2571_v1, %v2569_v12  ;;  %v2573_v22 = vpop.eup %2572 }
0x14a7   :  { %1204 = vrot.lane.b32.xlu0 %v1201_v20, %s2641_s3  ;;  %v1202_v24 = vmul.f32 0.0, %v1201_v20  ;;  %v980_v25 = vadd.f32 1.0, %v2573_v22 }
0x1519   :  { %v1205_v10 = vpop.permute.xlu0 %1204 }
0x151a   :  { %v1207_v21 = vmul.f32 %v1205_v10, %v1201_v20 }
0x151c   :  { %1209 = vrot.lane.b32.xlu1 %v1207_v21, %s2642_s23 }
0x158e   :  { %v1210_v26 = vpop.permute.xlu1 %1209 }
0x158f   :  { %v1212_v28 = vadd.f32 %v1210_v26, %v1202_v24 }
0x1591   :  { %2574 = vtanh.f32 %v1212_v28 }
0x1592   :  { %2576 = vrcp.f32 %v980_v25 }
0x1593   :  { %2578 = vtanh.f32 %v976_v9 }
0x159b   :  { %v2575_v29 = vpop.eup %2574 }
0x159c   :  { %v2577_v30 = vpop.eup %2576  ;;  %1215 = vrot.lane.b32.xlu0 %v2575_v29, %s2641_s3 }
0x159d   :  { %v2579_v31 = vpop.eup %2578 }
0x159e   :  { %v984_v32 = vsel %vm2747_vm5, %v2577_v30, %v2579_v31  ;;  %v1100_v30 = vadd.f32 %v2902_v42, %v2959_v13 }
0x159f   :  { %v985_v38 = vmul.f32 %v984_v32, %v2914_v53 }
0x15a0   :  { %987 = vrot.lane.b32.xlu0 %v984_v32, %s2641_s3 }
0x160e   :  { %v1216_v33 = vpop.permute.xlu0 %1215 }
0x160f   :  { %v1218_v34 = vmul.f32 %v1216_v33, %v1201_v20 }
0x1611   :  { %1220 = vrot.lane.b32.xlu1 %v1218_v34, %s2642_s23 }
0x1612   :  { %v988_v36 = vpop.permute.xlu0 %987 }
0x1613   :  { %v990_v35 = vmul.f32 %v988_v36, %v984_v32 }
0x1615   :  { %992 = vrot.lane.b32.xlu0 %v990_v35, %s2642_s23 }
0x1683   :  { %v1221_v37 = vpop.permute.xlu1 %1220 }
0x1684   :  { %2316 = vmatmul.mubr.msk.f32.vlgmr.msra.gmra.mrb[12].mxu1 %vm195_vm6, %v1221_v37 }
0x1685   :  { %2471 = vmatpush3.bf16.msra.mxu1 %v2924_v57  ;;  %2337 = vmatprep.mubr.msk.f32.mxu1 %vm2639_vm2, %v2640_v8 }
0x1686   :  { %2472 = vmatprep.subr.bf16.mxu1 %v2638_v0 }
0x1687   :  { %v993_v39 = vpop.permute.xlu0 %992 }
0x1688   :  { %v995_v40 = vadd.f32 %v993_v39, %v985_v38 }
0x1689   :  { %2474 = vmatpush3.bf16.msra.mxu1 %v2934_v60 }
0x168a   :  { %2580 = vtanh.f32 %v995_v40  ;;  %2481 = vmatprep.subr.bf16.mxu1 %v2638_v0 }
0x1694   :  { %v2581_v3 = vpop.eup %2580 }
0x1695   :  { %998 = vrot.lane.b32.xlu0 %v2581_v3, %s2641_s3 }
0x1707   :  { %v999_v43 = vpop.permute.xlu0 %998 }
0x1708   :  { %v1001_v44 = vmul.f32 %v999_v43, %v984_v32 }
0x170a   :  { %1014 = vrot.lane.b32.xlu0 %v1001_v44, %s2642_s23 }
0x1757   :  { %v1290_v47 = vpop.f32.mrb[12].mxu1 }
0x1758   :  { %v1294_v48 = vadd.f32 %v1290_v47, %v1090_v2  ;;  %v2317_v49 = vpop.f32.mrb[13].mxu1 }
0x175a   :  { %v2053_v50 = vmul.f32 -1.442695, %v1294_v48 }
0x175c   :  { %2582 = vpow2.f32 %v2053_v50  ;;  %v1105_v50 = vadd.f32 %v2959_v13, %v2908_v46 }
0x175d   :  { %2584 = vtanh.f32 %v1294_v48 }
0x1766   :  { %v2583_v51 = vpop.eup %2582 }
0x1767   :  { %v1298_v52 = vadd.f32 1.0, %v2583_v51  ;;  %v2585_v53 = vpop.eup %2584 }
0x1769   :  { %2586 = vrcp.f32 %v1298_v52 }
0x1773   :  { %v2587_v54 = vpop.eup %2586 }
0x1774   :  { %v1302_v55 = vsel %vm2747_vm5, %v2587_v54, %v2585_v53 }
0x1775   :  { %1305 = vrot.lane.b32.xlu1 %v1302_v55, %s2641_s3  ;;  %v1303_v63 = vmul.f32 %v1302_v55, %v1212_v28 }
0x177c   :  { %v1015_v56 = vpop.permute.xlu0 %1014 }
0x177d   :  { %2294 = vmatmul.mubr.msk.f32.gmra.mrb[20].mxu0 %vm195_vm6, %v1015_v56 }
0x177e   :  { %2326 = vmatprep.mubr.msk.f32.mxu0 %vm2639_vm2, %v2640_v8 }
0x17e7   :  { %v1306_v41 = vpop.permute.xlu1 %1305 }
0x17e8   :  { %v1308_v58 = vmul.f32 %v1306_v41, %v1302_v55 }
0x17ea   :  { %1310 = vrot.lane.b32.xlu1 %v1308_v58, %s2642_s23 }
0x1850   :  { %v2991_v59 = vpop.f32.mrb[20].mxu0 }
0x1851   :  { %v2993_v61 = vpop.f32.mrb[21].mxu0 }
0x185c   :  { %v1311_v5 = vpop.permute.xlu1 %1310 }
0x185d   :  { %v1313_v6 = vadd.f32 %v1311_v5, %v1303_v63 }
0x185f   :  { %2588 = vtanh.f32 %v1313_v6 }
0x1869   :  { %v2589_v7 = vpop.eup %2588 }
0x186a   :  { %1316 = vrot.lane.b32.xlu1 %v2589_v7, %s2641_s3 }
0x18dc   :  { %v1317_v9 = vpop.permute.xlu1 %1316 }
0x18dd   :  { %v1319_v11 = vmul.f32 %v1317_v9, %v1302_v55 }
0x18df   :  { %1321 = vrot.lane.b32.xlu1 %v1319_v11, %s2642_s23 }
0x1951   :  { %v1322_v14 = vpop.permute.xlu1 %1321 }
0x1952   :  { %2327 = vmatmul.mubr.msk.f32.vlgmr.msra.gmra.mrb[22].mxu0 %vm195_vm6, %v1322_v14 }
0x1953   :  { %2477 = vmatpush3.bf16.msra.mxu0 %v2924_v57  ;;  %2348 = vmatprep.mubr.msk.f32.mxu0 %vm2639_vm2, %v2640_v8 }
0x1954   :  { %2478 = vmatprep.subr.bf16.mxu0 %v2638_v0 }
0x1957   :  { %2480 = vmatpush3.bf16.msra.mxu0 %v2934_v60 }
0x1958   :  { %2487 = vmatprep.subr.bf16.mxu0 %v2638_v0 }
0x1a25   :  { %v1391_v16 = vpop.f32.mrb[22].mxu0 }
0x1a26   :  { %v1395_v17 = vadd.f32 %v1391_v16, %v1095_v15  ;;  %v2328_v18 = vpop.f32.mrb[23].mxu0 }
0x1a28   :  { %v2055_v4 = vmul.f32 -1.442695, %v1395_v17 }
0x1a2a   :  { %2590 = vpow2.f32 %v2055_v4 }
0x1a2b   :  { %2592 = vtanh.f32 %v1395_v17  ;;  %v1110_v17 = vadd.f32 %v2906_v45, %v2959_v13 }
0x1a34   :  { %v2591_v19 = vpop.eup %2590 }
0x1a35   :  { %v1399_v12 = vadd.f32 1.0, %v2591_v19  ;;  %v2593_v1 = vpop.eup %2592 }
0x1a37   :  { %2594 = vrcp.f32 %v1399_v12 }
0x1a41   :  { %v2595_v20 = vpop.eup %2594 }
0x1a42   :  { %v1403_v10 = vsel %vm2747_vm5, %v2595_v20, %v2593_v1 }
0x1a43   :  { %1406 = vrot.lane.b32.xlu0 %v1403_v10, %s2641_s3  ;;  %v1404_v27 = vmul.f32 %v1403_v10, %v1313_v6 }
0x1ab5   :  { %v1407_v21 = vpop.permute.xlu0 %1406 }
0x1ab6   :  { %v1409_v62 = vmul.f32 %v1407_v21, %v1403_v10 }
0x1ab8   :  { %1411 = vrot.lane.b32.xlu1 %v1409_v62, %s2642_s23 }
0x1b2a   :  { %v1412_v22 = vpop.permute.xlu1 %1411 }
0x1b2b   :  { %v1414_v24 = vadd.f32 %v1412_v22, %v1404_v27 }
0x1b2d   :  { %2596 = vtanh.f32 %v1414_v24 }
0x1b37   :  { %v2597_v25 = vpop.eup %2596 }
0x1b38   :  { %1417 = vrot.lane.b32.xlu0 %v2597_v25, %s2641_s3 }
0x1baa   :  { %v1418_v26 = vpop.permute.xlu0 %1417 }
0x1bab   :  { %v1420_v28 = vmul.f32 %v1418_v26, %v1403_v10 }
0x1bad   :  { %1422 = vrot.lane.b32.xlu1 %v1420_v28, %s2642_s23 }
0x1c1f   :  { %v1423_v29 = vpop.permute.xlu1 %1422 }
0x1c20   :  { %2338 = vmatmul.mubr.msk.f32.vlgmr.msra.gmra.mrb[14].mxu1 %vm195_vm6, %v1423_v29  ;;  %v1115_v29 = vadd.f32 %v2959_v13, %v2993_v61 }
0x1c21   :  { %2483 = vmatpush3.bf16.msra.mxu1 %v2924_v57  ;;  %2359 = vmatprep.mubr.msk.f32.mxu1 %vm2639_vm2, %v2640_v8 }
0x1c22   :  { %2484 = vmatprep.subr.bf16.mxu1 %v2638_v0 }
0x1c25   :  { %2486 = vmatpush3.bf16.msra.mxu1 %v2934_v60 }
0x1c26   :  { %2493 = vmatprep.subr.bf16.mxu1 %v2638_v0 }
0x1cf3   :  { %v1492_v31 = vpop.f32.mrb[14].mxu1 }
0x1cf4   :  { %v1496_v32 = vadd.f32 %v1492_v31, %v1100_v30  ;;  %v2339_v33 = vpop.f32.mrb[15].mxu1 }
0x1cf6   :  { %v2057_v34 = vmul.f32 -1.442695, %v1496_v32 }
0x1cf8   :  { %2598 = vpow2.f32 %v2057_v34 }
0x1cf9   :  { %2600 = vtanh.f32 %v1496_v32 }
0x1d02   :  { %v2599_v36 = vpop.eup %2598 }
0x1d03   :  { %v1500_v35 = vadd.f32 1.0, %v2599_v36  ;;  %v2601_v37 = vpop.eup %2600 }
0x1d05   :  { %2602 = vrcp.f32 %v1500_v35 }
0x1d0f   :  { %v2603_v38 = vpop.eup %2602 }
0x1d10   :  { %v1504_v39 = vsel %vm2747_vm5, %v2603_v38, %v2601_v37 }
0x1d11   :  { %1507 = vrot.lane.b32.xlu0 %v1504_v39, %s2641_s3  ;;  %v1505_v42 = vmul.f32 %v1504_v39, %v1414_v24 }
0x1d83   :  { %v1508_v40 = vpop.permute.xlu0 %1507 }
0x1d84   :  { %v1510_v3 = vmul.f32 %v1508_v40, %v1504_v39 }
0x1d86   :  { %1512 = vrot.lane.b32.xlu1 %v1510_v3, %s2642_s23 }
0x1df8   :  { %v1513_v43 = vpop.permute.xlu1 %1512 }
0x1df9   :  { %v1515_v44 = vadd.f32 %v1513_v43, %v1505_v42 }
0x1dfb   :  { %2604 = vtanh.f32 %v1515_v44 }
0x1e05   :  { %v2605_v2 = vpop.eup %2604 }
0x1e06   :  { %1518 = vrot.lane.b32.xlu0 %v2605_v2, %s2641_s3 }
0x1e78   :  { %v1519_v47 = vpop.permute.xlu0 %1518 }
0x1e79   :  { %v1521_v48 = vmul.f32 %v1519_v47, %v1504_v39  ;;  %v1120_v47 = vadd.f32 %v2991_v59, %v2959_v13 }
0x1e7b   :  { %1523 = vrot.lane.b32.xlu1 %v1521_v48, %s2642_s23 }
0x1eed   :  { %v1524_v49 = vpop.permute.xlu1 %1523 }
0x1eee   :  { %2349 = vmatmul.mubr.msk.f32.vlgmr.msra.gmra.mrb[24].mxu0 %vm195_vm6, %v1524_v49 }
0x1eef   :  { %2489 = vmatpush3.bf16.msra.mxu0 %v2924_v57  ;;  %2370 = vmatprep.mubr.msk.f32.mxu0 %vm2639_vm2, %v2640_v8 }
0x1ef0   :  { %2490 = vmatprep.subr.bf16.mxu0 %v2638_v0 }
0x1ef3   :  { %2492 = vmatpush3.bf16.msra.mxu0 %v2934_v60 }
0x1ef4   :  { %2499 = vmatprep.subr.bf16.mxu0 %v2638_v0 }
0x1fc1   :  { %v1593_v51 = vpop.f32.mrb[24].mxu0 }
0x1fc2   :  { %v1597_v52 = vadd.f32 %v1593_v51, %v1105_v50  ;;  %v2350_v53 = vpop.f32.mrb[25].mxu0 }
0x1fc4   :  { %v2059_v54 = vmul.f32 -1.442695, %v1597_v52 }
0x1fc6   :  { %2606 = vpow2.f32 %v2059_v54 }
0x1fc7   :  { %2608 = vtanh.f32 %v1597_v52 }
0x1fd0   :  { %v2607_v55 = vpop.eup %2606 }
0x1fd1   :  { %v1601_v56 = vadd.f32 1.0, %v2607_v55  ;;  %v2609_v41 = vpop.eup %2608 }
0x1fd3   :  { %2610 = vrcp.f32 %v1601_v56 }
0x1fdd   :  { %v2611_v58 = vpop.eup %2610 }
0x1fde   :  { %v1605_v63 = vsel %vm2747_vm5, %v2611_v58, %v2609_v41 }
0x1fdf   :  { %1608 = vrot.lane.b32.xlu0 %v1605_v63, %s2641_s3  ;;  %v1606_v46 = vmul.f32 %v1605_v63, %v1515_v44 }
0x2051   :  { %v1609_v5 = vpop.permute.xlu0 %1608 }
0x2052   :  { %v1611_v6 = vmul.f32 %v1609_v5, %v1605_v63  ;;  %v1926_v5 = vld [vmem:[%s3103_s7] sm:$0xff] }
0x2054   :  { %1613 = vrot.lane.b32.xlu1 %v1611_v6, %s2642_s23  ;;  %v1927_v6 = vld [vmem:[%s3103_s7 + $0x8] sm:$0xff] }
0x20c6   :  { %v1614_v7 = vpop.permute.xlu1 %1613 }
0x20c7   :  { %v1616_v9 = vadd.f32 %v1614_v7, %v1606_v46  ;;  %v2500_v46 = vpack.c.bf16 %v1927_v6, %v1926_v5  ;;  %v1929_v7 = vld [vmem:[%s3103_s7 + $0x18] sm:$0xff] }
0x20c9   :  { %2612 = vtanh.f32 %v1616_v9 }
0x20d3   :  { %v2613_v11 = vpop.eup %2612 }
0x20d4   :  { %1619 = vrot.lane.b32.xlu0 %v2613_v11, %s2641_s3 }
0x2146   :  { %v1620_v14 = vpop.permute.xlu0 %1619 }
0x2147   :  { %v1622_v15 = vmul.f32 %v1620_v14, %v1605_v63 }
0x2149   :  { %1624 = vrot.lane.b32.xlu1 %v1622_v15, %s2642_s23 }
0x21bb   :  { %v1625_v16 = vpop.permute.xlu1 %1624 }
0x21bc   :  { %2360 = vmatmul.mubr.msk.f32.vlgmr.msra.gmra.mrb[16].mxu1 %vm195_vm6, %v1625_v16 }
0x21bd   :  { %2495 = vmatpush3.bf16.msra.mxu1 %v2924_v57  ;;  %2381 = vmatprep.mubr.msk.f32.mxu1 %vm2639_vm2, %v2640_v8 }
0x21be   :  { %2496 = vmatprep.subr.bf16.mxu1 %v2638_v0 }
0x21c1   :  { %2498 = vmatpush3.bf16.msra.mxu1 %v2934_v60 }
0x228f   :  { %v1694_v18 = vpop.f32.mrb[16].mxu1 }
0x2290   :  { %v1698_v4 = vadd.f32 %v1694_v18, %v1110_v17  ;;  %v2361_v19 = vpop.f32.mrb[17].mxu1  ;;  %v2066_v17 = vld [vmem:[%s3104_s8] ss:$0 sm:$0xff] }
0x2292   :  { %v2061_v12 = vmul.f32 -1.442695, %v1698_v4 }
0x2294   :  { %2614 = vpow2.f32 %v2061_v12 }
0x2295   :  { %2616 = vtanh.f32 %v1698_v4 }
0x229e   :  { %v2615_v1 = vpop.eup %2614 }
0x229f   :  { %v1702_v20 = vadd.f32 1.0, %v2615_v1  ;;  %v2617_v57 = vpop.eup %2616 }
0x22a1   :  { %2618 = vrcp.f32 %v1702_v20 }
0x22ab   :  { %v2619_v10 = vpop.eup %2618 }
0x22ac   :  { %v1706_v21 = vsel %vm2747_vm5, %v2619_v10, %v2617_v57 }
0x22ad   :  { %1709 = vrot.lane.b32.xlu0 %v1706_v21, %s2641_s3  ;;  %v1707_v45 = vmul.f32 %v1706_v21, %v1616_v9  ;;  %v2503_v9 = vpack.c.bf16 %v1929_v7, %v1928_v23 }
0x231f   :  { %v1710_v60 = vpop.permute.xlu0 %1709 }
0x2320   :  { %v1712_v62 = vmul.f32 %v1710_v60, %v1706_v21 }
0x2322   :  { %1714 = vrot.lane.b32.xlu1 %v1712_v62, %s2642_s23 }
0x2394   :  { %v1715_v27 = vpop.permute.xlu1 %1714 }
0x2395   :  { %v1717_v22 = vadd.f32 %v1715_v27, %v1707_v45 }
0x2397   :  { %2620 = vtanh.f32 %v1717_v22 }
0x23a1   :  { %v2621_v24 = vpop.eup %2620 }
0x23a2   :  { %1720 = vrot.lane.b32.xlu0 %v2621_v24, %s2641_s3 }
0x2414   :  { %v1721_v25 = vpop.permute.xlu0 %1720 }
0x2415   :  { %v1723_v26 = vmul.f32 %v1721_v25, %v1706_v21 }
0x2417   :  { %1725 = vrot.lane.b32.xlu1 %v1723_v26, %s2642_s23 }
0x2489   :  { %v1726_v28 = vpop.permute.xlu1 %1725 }
0x248a   :  { %2371 = vmatmul.mubr.msk.f32.vlgmr.msra.gmra.mrb[26].mxu0 %vm195_vm6, %v1726_v28 }
0x248b   :  { %2392 = vmatprep.mubr.msk.f32.mxu0 %vm2639_vm2, %v2640_v8  ;;  %2501 = vmatpush3.bf16.msra.mxu0 %v2500_v46 }
0x248c   :  { %2502 = vmatprep.subr.bf16.mxu0 %v2638_v0 }
0x248f   :  { %2504 = vmatpush3.bf16.msra.mxu0 %v2503_v9 }
0x255d   :  { %v1795_v30 = vpop.f32.mrb[26].mxu0 }
0x255e   :  { %v1799_v31 = vadd.f32 %v1795_v30, %v1115_v29  ;;  %v2372_v32 = vpop.f32.mrb[27].mxu0 }
0x2560   :  { %v2063_v33 = vmul.f32 -1.442695, %v1799_v31 }
0x2562   :  { %2622 = vpow2.f32 %v2063_v33 }
0x2563   :  { %2624 = vtanh.f32 %v1799_v31 }
0x256c   :  { %v2623_v34 = vpop.eup %2622 }
0x256d   :  { %v1803_v36 = vadd.f32 1.0, %v2623_v34  ;;  %v2625_v35 = vpop.eup %2624 }
0x256f   :  { %2626 = vrcp.f32 %v1803_v36 }
0x2579   :  { %v2627_v37 = vpop.eup %2626 }
0x257a   :  { %v1807_v38 = vsel %vm2747_vm5, %v2627_v37, %v2625_v35 }
0x257b   :  { %1810 = vrot.lane.b32.xlu0 %v1807_v38, %s2641_s3  ;;  %v1808_v61 = vmul.f32 %v1807_v38, %v1717_v22 }
0x25ed   :  { %v1811_v8 = vpop.permute.xlu0 %1810 }
0x25ee   :  { %v1813_v39 = vmul.f32 %v1811_v8, %v1807_v38 }
0x25f0   :  { %1815 = vrot.lane.b32.xlu1 %v1813_v39, %s2642_s23 }
0x2662   :  { %v1816_v40 = vpop.permute.xlu1 %1815 }
0x2663   :  { %v1818_v3 = vadd.f32 %v1816_v40, %v1808_v61 }
0x2665   :  { %2628 = vtanh.f32 %v1818_v3 }
0x266f   :  { %v2629_v42 = vpop.eup %2628 }
0x2670   :  { %1821 = vrot.lane.b32.xlu0 %v2629_v42, %s2641_s3 }
0x26e2   :  { %v1822_v43 = vpop.permute.xlu0 %1821 }
0x26e3   :  { %v1824_v44 = vmul.f32 %v1822_v43, %v1807_v38 }
0x26e5   :  { %1826 = vrot.lane.b32.xlu1 %v1824_v44, %s2642_s23 }
0x2757   :  { %v1827_v2 = vpop.permute.xlu1 %1826 }
0x2758   :  { %2382 = vmatmul.mubr.msk.f32.vlgmr.msra.gmra.mrb[18].mxu1 %vm195_vm6, %v1827_v2 }
0x282b   :  { %v1896_v48 = vpop.f32.mrb[18].mxu1 }
0x282c   :  { %v1900_v49 = vadd.f32 %v1896_v48, %v1120_v47  ;;  %v2383_v50 = vpop.f32.mrb[19].mxu1 }
0x282e   :  { %v2065_v51 = vmul.f32 -1.442695, %v1900_v49 }
0x2830   :  { %2630 = vpow2.f32 %v2065_v51 }
0x2831   :  { %2632 = vtanh.f32 %v1900_v49 }
0x283a   :  { %v2631_v52 = vpop.eup %2630 }
0x283b   :  { %v1904_v53 = vadd.f32 1.0, %v2631_v52  ;;  %v2633_v54 = vpop.eup %2632 }
0x283d   :  { %2634 = vrcp.f32 %v1904_v53 }
0x2847   :  { %v2635_v55 = vpop.eup %2634 }
0x2848   :  { %v1908_v56 = vsel %vm2747_vm5, %v2635_v55, %v2633_v54 }
0x2849   :  { %1911 = vrot.lane.b32.xlu0 %v1908_v56, %s2641_s3  ;;  %v1909_v13 = vmul.f32 %v1908_v56, %v1818_v3 }
0x28bb   :  { %v1912_v41 = vpop.permute.xlu0 %1911 }
0x28bc   :  { %v1914_v58 = vmul.f32 %v1912_v41, %v1908_v56 }
0x28be   :  { %1916 = vrot.lane.b32.xlu1 %v1914_v58, %s2642_s23 }
0x2930   :  { %v1917_v59 = vpop.permute.xlu1 %1916 }
0x2931   :  { %v1919_v63 = vadd.f32 %v1917_v59, %v1909_v13 }
0x2933   :  { %2636 = vtanh.f32 %v1919_v63 }
0x293d   :  { %v2637_v11 = vpop.eup %2636 }
0x293e   :  { %1922 = vrot.lane.b32.xlu0 %v2637_v11, %s2641_s3 }
0x29b0   :  { %v1923_v14 = vpop.permute.xlu0 %1922 }
0x29b1   :  { %v1925_v15 = vmul.f32 %v1923_v14, %v1908_v56 }
0x29b3   :  { %1938 = vrot.lane.b32.xlu1 %v1925_v15, %s2642_s23 }
0x2a25   :  { %v1939_v16 = vpop.permute.xlu1 %1938 }
0x2a26   :  { %2393 = vmatmul.mubr.msk.f32.vlgmr.msra.gmra.mrb[28].mxu0 %vm195_vm6, %v1939_v16 }
0x2af9   :  { %v2008_v18 = vpop.f32.mrb[28].mxu0 }
0x2afa   :  { %v2009_v4 = vadd.f32 %v2066_v17, %v2008_v18  ;;  %v2394_v19 = vpop.f32.mrb[29].mxu0 }
0x2afc   :  { %2012 = vst [vmem:[%s3105_s9] sm:$0xff] %v2009_v4 }

</bundles_post_ra>
